<compile_context>
chip_gen: v5e
topology: v5e:2x2
jax: 0.10.0
libtpu: 0.0.40
codegen_flags: <defaults>
</compile_context>

<pallas_src>
import jax
import jax.numpy as jnp
from jax import lax
from jax.experimental import pallas as pl
from jax.experimental.pallas import tpu as pltpu


def _round_up(n, m):
    return ((n + m - 1) // m) * m


# ------------------------------------------------------------------ fused whole-net kernel
def make_fused_kernel(num_layers):
    """Kernel ref order:
      x_ref  : (T, BT, D_pad)   time-major batch-tile input (zero padded)
      x0_ref : (BT, T)          residual term x[:, :, 0]
      per layer l: wih_ref (Din_l, G4), whh_ref (H, G4), b_ref (1, G4)
                   gate columns packed densely: [i | f | g | o], each H wide, then zero
                   padded up to G4 = round_up(4H, 128)
      hw_ref : (1, H)           collapsed head weight row (fc2_w @ fc1_w)
      hb_ref : (1, 1)           collapsed head bias       (fc2_w @ fc1_b + fc2_b)
      y_ref  : (BT, T)          output, time on the lane axis
    """
    def kernel(*refs):
        x_ref, x0_ref = refs[0], refs[1]
        w_refs = refs[2:2 + 3 * num_layers]
        hw_ref = refs[2 + 3 * num_layers]
        hb_ref = refs[3 + 3 * num_layers]
        y_ref = refs[4 + 3 * num_layers]

        T, BT, _ = x_ref.shape
        H = hw_ref.shape[1]

        # layer-0 input as one (T*BT, D_pad) slab for the batched input projection
        layer_in = jnp.concatenate([x_ref[t] for t in range(T)], axis=0)
        # hoisted out of the time loop (JAX does not CSE broadcast_in_dim)
        hw_b = jnp.broadcast_to(hw_ref[...], (BT, H))

        y_cols = []
        for l in range(num_layers):
            wih_ref, whh_ref, b_ref = w_refs[3 * l:3 * l + 3]
            # Input-side projection for ALL time steps in one MXU matmul (+ bias),
            # off the serial h-recurrence critical path.
            p = jnp.dot(layer_in, wih_ref[...],
                        preferred_element_type=jnp.float32) + b_ref[...]
            whh = whh_ref[...]

            h = jnp.zeros((BT, H), jnp.float32)   # h0 = c0 = 0, as in the module
            c = jnp.zeros((BT, H), jnp.float32)
            h_list = []
            last = (l == num_layers - 1)
            # fully unrolled: T is small and static
            for t in range(T):
                gates = jnp.dot(h, whh, preferred_element_type=jnp.float32) \
                        + p[t * BT:(t + 1) * BT, :]
                # dense [i|f|g|o] packing: one sigmoid + one tanh over the whole block
                sig = jax.nn.sigmoid(gates)
                th = jnp.tanh(gates)
                i_g = sig[:, 0 * H:1 * H]
                f_g = sig[:, 1 * H:2 * H]
                g_g = th[:, 2 * H:3 * H]
                o_g = sig[:, 3 * H:4 * H]
                c = f_g * c + i_g * g_g
                h = o_g * jnp.tanh(c)
                if last:
                    # fused head: per-step lane reduce (XLU slot), no epilogue / scratch
                    y_cols.append(jnp.sum(h * hw_b, axis=-1, keepdims=True))
                else:
                    h_list.append(h)
            if not last:
                # next layer's input, stays in registers/VMEM values (no scratch store)
                layer_in = jnp.concatenate(h_list, axis=0)   # (T*BT, H)

        y = jnp.concatenate(y_cols, axis=1)                  # (BT, T)
        y_ref[...] = y + hb_ref[...] + x0_ref[...]
    return kernel


# ------------------------------------------------------------------ wrapper
def prices_forward(x, packed):
    """x: (B, T, in_features) float32 -> (B, T, 1) float32."""
    B, T, D = x.shape
    layers = packed["layers"]
    num_layers = len(layers)
    H = packed["head_w"].shape[1]
    D_pad = layers[0][0].shape[0]

    # Batch tiling: >=2 parallel tiles when batch allows (v7x has 2 TCs), otherwise one
    # big tile (serial grid on v5e/v6e; amortize per-step + per-matmul fixed latency).
    B8 = _round_up(max(B, 1), 8)
    if B8 <= 8:
        n_tiles = 1
    elif B8 <= 512:
        n_tiles = 2
    else:
        n_tiles = -(-B8 // 256)
    BT = _round_up(-(-B8 // n_tiles), 8)
    B_pad = BT * n_tiles

    # time-major + zero-pad batch/feature dims (one pass over the smallest tensor)
    x_tm = jnp.transpose(x, (1, 0, 2))                               # (T, B, D)
    x_tm = jnp.pad(x_tm, ((0, 0), (0, B_pad - B), (0, D_pad - D)))   # (T, B_pad, D_pad)
    x0 = jnp.pad(x[:, :, 0], ((0, B_pad - B), (0, 0)))               # (B_pad, T)

    weight_args = []
    in_specs = [
        pl.BlockSpec((T, BT, D_pad), lambda i: (0, i, 0)),
        pl.BlockSpec((BT, T), lambda i: (i, 0)),
    ]
    for (wih, whh, b) in layers:
        weight_args += [wih, whh, b]
        # constant block index -> weights resident across grid steps (no extra DMA)
        in_specs += [pl.BlockSpec(wih.shape, lambda i: (0, 0)),
                     pl.BlockSpec(whh.shape, lambda i: (0, 0)),
                     pl.BlockSpec(b.shape, lambda i: (0, 0))]
    weight_args += [packed["head_w"], packed["head_b"]]
    in_specs += [pl.BlockSpec(packed["head_w"].shape, lambda i: (0, 0)),
                 pl.BlockSpec(packed["head_b"].shape, lambda i: (0, 0))]

    y = pl.pallas_call(
        make_fused_kernel(num_layers),
        out_shape=jax.ShapeDtypeStruct((B_pad, T), jnp.float32),
        grid=(n_tiles,),
        in_specs=in_specs,
        out_specs=pl.BlockSpec((BT, T), lambda i: (i, 0)),
        compiler_params=pltpu.CompilerParams(
            dimension_semantics=("parallel",)),
    )(x_tm, x0, *weight_args)

    return y[:B, :, None]                                            # (B, T, 1)


# ------------------------------------------------------------------ parameter packing
def pack_params(raw, in_features, hidden, num_layers):
    """PyTorch-layout params -> dense-gate / fused-head kernel operands (done offline)."""
    H = hidden
    G4 = _round_up(4 * H, 128)
    D_pad = _round_up(in_features, 8)

    def pad_cols(w):  # (K, 4H) -> (K, G4): gates packed densely [i|f|g|o], zero tail
        if w.shape[1] == G4:
            return w.astype(jnp.float32)
        return jnp.zeros((w.shape[0], G4), jnp.float32).at[:, :w.shape[1]].set(w)

    layers = []
    for l in range(num_layers):
        wih, whh, bih, bhh = raw["lstm"][l]          # (4H, Din), (4H, H), (4H,), (4H,)
        Din = wih.shape[1]
        Din_pad = D_pad if l == 0 else H
        wih_p = jnp.zeros((Din_pad, G4), jnp.float32)
        wih_p = wih_p.at[:Din, :].set(pad_cols(wih.T))     # (Din_pad, G4)
        whh_p = pad_cols(whh.T)                            # (H, G4)
        b_p = pad_cols((bih + bhh)[None, :])               # (1, G4)
        layers.append((wih_p, whh_p, b_p))

    # collapse fc1 -> fc2 (no nonlinearity between them in the module)
    fc1_w, fc1_b = raw["fc1_w"], raw["fc1_b"]     # (H2, H), (H2,)
    fc2_w, fc2_b = raw["fc2_w"], raw["fc2_b"]     # (1, H2), (1,)
    head_w = (fc2_w @ fc1_w).astype(jnp.float32)                    # (1, H)
    head_b = (fc2_w @ fc1_b + fc2_b).reshape(1, 1).astype(jnp.float32)
    return {"layers": layers, "head_w": head_w, "head_b": head_b}


# ------------------------------------------------------------------ deterministic raw params
def init_raw_params(key, in_features, hidden, num_layers, out_features=1):
    bound = 1.0 / jnp.sqrt(hidden)
    raw = {"lstm": []}
    for l in range(num_layers):
        d_in = in_features if l == 0 else hidden
        key, k1, k2, k3, k4 = jax.random.split(key, 5)
        wih = jax.random.uniform(k1, (4 * hidden, d_in), jnp.float32, -bound, bound)
        whh = jax.random.uniform(k2, (4 * hidden, hidden), jnp.float32, -bound, bound)
        bih = jax.random.uniform(k3, (4 * hidden,), jnp.float32, -bound, bound)
        bhh = jax.random.uniform(k4, (4 * hidden,), jnp.float32, -bound, bound)
        raw["lstm"].append((wih, whh, bih, bhh))
    h2 = hidden // 2
    key, k1, k2, k3, k4 = jax.random.split(key, 5)
    b1 = 1.0 / jnp.sqrt(hidden)
    b2 = 1.0 / jnp.sqrt(h2)
    raw["fc1_w"] = jax.random.uniform(k1, (h2, hidden), jnp.float32, -b1, b1)
    raw["fc1_b"] = jax.random.uniform(k2, (h2,), jnp.float32, -b1, b1)
    raw["fc2_w"] = jax.random.uniform(k3, (out_features, h2), jnp.float32, -b2, b2)
    raw["fc2_b"] = jax.random.uniform(k4, (out_features,), jnp.float32, -b2, b2)
    return raw


# ------------------------------------------------------------------ pure-JAX reference
def reference_forward(x, raw):
    B, T, _ = x.shape
    layer_in = x
    for (wih, whh, bih, bhh) in raw["lstm"]:
        H = whh.shape[1]
        wih_t, whh_t = wih.T, whh.T
        b = (bih + bhh)[None, :]

        def step(carry, x_t, wih_t=wih_t, whh_t=whh_t, b=b, H=H):
            h, c = carry
            gates = x_t @ wih_t + h @ whh_t + b
            i_g = jax.nn.sigmoid(gates[:, 0 * H:1 * H])
            f_g = jax.nn.sigmoid(gates[:, 1 * H:2 * H])
            g_g = jnp.tanh(gates[:, 2 * H:3 * H])
            o_g = jax.nn.sigmoid(gates[:, 3 * H:4 * H])
            c_new = f_g * c + i_g * g_g
            h_new = o_g * jnp.tanh(c_new)
            return (h_new, c_new), h_new

        init = (jnp.zeros((B, H), jnp.float32), jnp.zeros((B, H), jnp.float32))
        _, outs = lax.scan(step, init, jnp.transpose(layer_in, (1, 0, 2)))
        layer_in = jnp.transpose(outs, (1, 0, 2))
    out = layer_in @ raw["fc1_w"].T + raw["fc1_b"]
    out = out @ raw["fc2_w"].T + raw["fc2_b"]
    return x[:, :, 0, None] + out


if __name__ == "__main__":
    B, T, IN_FEATURES, HIDDEN, NUM_LAYERS = 2, 8, 4, 32, 2

    key = jax.random.PRNGKey(0)
    kx, kp = jax.random.split(key)
    x = jax.random.normal(kx, (B, T, IN_FEATURES), jnp.float32)
    raw = init_raw_params(kp, IN_FEATURES, HIDDEN, NUM_LAYERS, out_features=1)
    packed = pack_params(raw, IN_FEATURES, HIDDEN, NUM_LAYERS)

    forward = jax.jit(prices_forward)
    y = forward(x, packed)
    y = jax.block_until_ready(y)

    y_ref = reference_forward(x, raw)
    assert y.shape == (B, T, 1), y.shape
    assert jnp.allclose(y, y_ref, atol=1e-4, rtol=1e-4), (
        "mismatch vs reference, max abs err = %g" % float(jnp.max(jnp.abs(y - y_ref))))

    print("KERNEL_OK")
</pallas_src>

<mosaic_0001>
module attributes {stable_mosaic.version = 11 : i64} {
  func.func @kernel(%arg0: i32, %arg1: memref<8x8x8xf32, #tpu.memory_space<vmem>>, %arg2: memref<8x8xf32, #tpu.memory_space<vmem>>, %arg3: memref<8x128xf32, #tpu.memory_space<vmem>>, %arg4: memref<32x128xf32, #tpu.memory_space<vmem>>, %arg5: memref<1x128xf32, #tpu.memory_space<vmem>>, %arg6: memref<32x128xf32, #tpu.memory_space<vmem>>, %arg7: memref<32x128xf32, #tpu.memory_space<vmem>>, %arg8: memref<1x128xf32, #tpu.memory_space<vmem>>, %arg9: memref<1x32xf32, #tpu.memory_space<vmem>>, %arg10: memref<1x1xf32, #tpu.memory_space<vmem>>, %arg11: memref<8x8xf32, #tpu.memory_space<vmem>>) attributes {dimension_semantics = [#tpu.dimension_semantics<parallel>], iteration_bounds = array<i64: 1>, scalar_prefetch = 0 : i64, scratch_operands = 0 : i64, tpu.core_type = #tpu.core_type<tc>, window_params = [{transform_indices = @transform_0, window_bounds = array<i64: 8, 8, 8>}, {transform_indices = @transform_1, window_bounds = array<i64: 8, 8>}, {pipeline_mode = #tpu.pipeline_mode<synchronous>, transform_indices = @transform_2, window_bounds = array<i64: 8, 128>}, {pipeline_mode = #tpu.pipeline_mode<synchronous>, transform_indices = @transform_3, window_bounds = array<i64: 32, 128>}, {pipeline_mode = #tpu.pipeline_mode<synchronous>, transform_indices = @transform_4, window_bounds = array<i64: 1, 128>}, {pipeline_mode = #tpu.pipeline_mode<synchronous>, transform_indices = @transform_5, window_bounds = array<i64: 32, 128>}, {pipeline_mode = #tpu.pipeline_mode<synchronous>, transform_indices = @transform_6, window_bounds = array<i64: 32, 128>}, {pipeline_mode = #tpu.pipeline_mode<synchronous>, transform_indices = @transform_7, window_bounds = array<i64: 1, 128>}, {pipeline_mode = #tpu.pipeline_mode<synchronous>, transform_indices = @transform_8, window_bounds = array<i64: 1, 32>}, {pipeline_mode = #tpu.pipeline_mode<synchronous>, transform_indices = @transform_9, window_bounds = array<i64: 1, 1>}, {transform_indices = @transform_10, window_bounds = array<i64: 8, 8>}]} {
    %c0 = arith.constant 0 : index
    %c0_0 = arith.constant 0 : index
    %c0_1 = arith.constant 0 : index
    %0 = vector.load %arg1[%c0, %c0_0, %c0_1] : memref<8x8x8xf32, #tpu.memory_space<vmem>>, vector<1x8x8xf32>
    %1 = vector.shape_cast %0 : vector<1x8x8xf32> to vector<8x8xf32>
    %c1 = arith.constant 1 : index
    %c0_2 = arith.constant 0 : index
    %c0_3 = arith.constant 0 : index
    %2 = vector.load %arg1[%c1, %c0_2, %c0_3] : memref<8x8x8xf32, #tpu.memory_space<vmem>>, vector<1x8x8xf32>
    %3 = vector.shape_cast %2 : vector<1x8x8xf32> to vector<8x8xf32>
    %c2 = arith.constant 2 : index
    %c0_4 = arith.constant 0 : index
    %c0_5 = arith.constant 0 : index
    %4 = vector.load %arg1[%c2, %c0_4, %c0_5] : memref<8x8x8xf32, #tpu.memory_space<vmem>>, vector<1x8x8xf32>
    %5 = vector.shape_cast %4 : vector<1x8x8xf32> to vector<8x8xf32>
    %c3 = arith.constant 3 : index
    %c0_6 = arith.constant 0 : index
    %c0_7 = arith.constant 0 : index
    %6 = vector.load %arg1[%c3, %c0_6, %c0_7] : memref<8x8x8xf32, #tpu.memory_space<vmem>>, vector<1x8x8xf32>
    %7 = vector.shape_cast %6 : vector<1x8x8xf32> to vector<8x8xf32>
    %c4 = arith.constant 4 : index
    %c0_8 = arith.constant 0 : index
    %c0_9 = arith.constant 0 : index
    %8 = vector.load %arg1[%c4, %c0_8, %c0_9] : memref<8x8x8xf32, #tpu.memory_space<vmem>>, vector<1x8x8xf32>
    %9 = vector.shape_cast %8 : vector<1x8x8xf32> to vector<8x8xf32>
    %c5 = arith.constant 5 : index
    %c0_10 = arith.constant 0 : index
    %c0_11 = arith.constant 0 : index
    %10 = vector.load %arg1[%c5, %c0_10, %c0_11] : memref<8x8x8xf32, #tpu.memory_space<vmem>>, vector<1x8x8xf32>
    %11 = vector.shape_cast %10 : vector<1x8x8xf32> to vector<8x8xf32>
    %c6 = arith.constant 6 : index
    %c0_12 = arith.constant 0 : index
    %c0_13 = arith.constant 0 : index
    %12 = vector.load %arg1[%c6, %c0_12, %c0_13] : memref<8x8x8xf32, #tpu.memory_space<vmem>>, vector<1x8x8xf32>
    %13 = vector.shape_cast %12 : vector<1x8x8xf32> to vector<8x8xf32>
    %c7 = arith.constant 7 : index
    %c0_14 = arith.constant 0 : index
    %c0_15 = arith.constant 0 : index
    %14 = vector.load %arg1[%c7, %c0_14, %c0_15] : memref<8x8x8xf32, #tpu.memory_space<vmem>>, vector<1x8x8xf32>
    %15 = vector.shape_cast %14 : vector<1x8x8xf32> to vector<8x8xf32>
    %16 = tpu.concatenate %1, %3, %5, %7, %9, %11, %13, %15 in 0 : vector<8x8xf32>, vector<8x8xf32>, vector<8x8xf32>, vector<8x8xf32>, vector<8x8xf32>, vector<8x8xf32>, vector<8x8xf32>, vector<8x8xf32> -> vector<64x8xf32>
    %c0_16 = arith.constant 0 : index
    %c0_17 = arith.constant 0 : index
    %17 = vector.load %arg9[%c0_16, %c0_17] : memref<1x32xf32, #tpu.memory_space<vmem>>, vector<1x32xf32>
    %18 = vector.shape_cast %17 : vector<1x32xf32> to vector<1x32xf32>
    %19 = vector.broadcast %18 : vector<1x32xf32> to vector<8x32xf32>
    %c0_18 = arith.constant 0 : index
    %c0_19 = arith.constant 0 : index
    %20 = vector.load %arg3[%c0_18, %c0_19] : memref<8x128xf32, #tpu.memory_space<vmem>>, vector<8x128xf32>
    %cst = arith.constant dense<0.000000e+00> : vector<64x128xf32>
    %21 = tpu.matmul %16, %20, %cst {dimension_numbers = #tpu.dot_dimension_numbers<[1], [0], [0], [1], [0, 0, 1, 1], [], []>} : vector<64x8xf32>, vector<8x128xf32>, vector<64x128xf32> -> vector<64x128xf32>
    %c0_20 = arith.constant 0 : index
    %c0_21 = arith.constant 0 : index
    %22 = vector.load %arg5[%c0_20, %c0_21] : memref<1x128xf32, #tpu.memory_space<vmem>>, vector<1x128xf32>
    %23 = vector.broadcast %22 : vector<1x128xf32> to vector<64x128xf32>
    %24 = arith.addf %21, %23 : vector<64x128xf32>
    %c0_22 = arith.constant 0 : index
    %c0_23 = arith.constant 0 : index
    %25 = vector.load %arg4[%c0_22, %c0_23] : memref<32x128xf32, #tpu.memory_space<vmem>>, vector<32x128xf32>
    %cst_24 = arith.constant 0.000000e+00 : f32
    %26 = vector.broadcast %cst_24 : f32 to vector<8x32xf32>
    %cst_25 = arith.constant 0.000000e+00 : f32
    %27 = vector.broadcast %cst_25 : f32 to vector<8x32xf32>
    %cst_26 = arith.constant dense<0.000000e+00> : vector<8x128xf32>
    %28 = tpu.matmul %26, %25, %cst_26 {dimension_numbers = #tpu.dot_dimension_numbers<[1], [0], [0], [1], [0, 0, 1, 1], [], []>} : vector<8x32xf32>, vector<32x128xf32>, vector<8x128xf32> -> vector<8x128xf32>
    %29 = vector.extract_strided_slice %24 {offsets = [0, 0], sizes = [8, 128], strides = [1, 1]} : vector<64x128xf32> to vector<8x128xf32>
    %30 = arith.addf %28, %29 : vector<8x128xf32>
    %31 = arith.negf %30 : vector<8x128xf32>
    %32 = math.exp %31 : vector<8x128xf32>
    %cst_27 = arith.constant 1.000000e+00 : f32
    %33 = vector.broadcast %cst_27 : f32 to vector<8x128xf32>
    %34 = arith.addf %33, %32 : vector<8x128xf32>
    %35 = arith.divf %33, %34 : vector<8x128xf32>
    %36 = math.tanh %30 : vector<8x128xf32>
    %37 = vector.extract_strided_slice %35 {offsets = [0, 0], sizes = [8, 32], strides = [1, 1]} : vector<8x128xf32> to vector<8x32xf32>
    %38 = vector.extract_strided_slice %35 {offsets = [0, 32], sizes = [8, 32], strides = [1, 1]} : vector<8x128xf32> to vector<8x32xf32>
    %39 = vector.extract_strided_slice %36 {offsets = [0, 64], sizes = [8, 32], strides = [1, 1]} : vector<8x128xf32> to vector<8x32xf32>
    %40 = vector.extract_strided_slice %35 {offsets = [0, 96], sizes = [8, 32], strides = [1, 1]} : vector<8x128xf32> to vector<8x32xf32>
    %41 = arith.mulf %38, %27 : vector<8x32xf32>
    %42 = arith.mulf %37, %39 : vector<8x32xf32>
    %43 = arith.addf %41, %42 : vector<8x32xf32>
    %44 = math.tanh %43 : vector<8x32xf32>
    %45 = arith.mulf %40, %44 : vector<8x32xf32>
    %cst_28 = arith.constant dense<0.000000e+00> : vector<8x128xf32>
    %46 = tpu.matmul %45, %25, %cst_28 {dimension_numbers = #tpu.dot_dimension_numbers<[1], [0], [0], [1], [0, 0, 1, 1], [], []>} : vector<8x32xf32>, vector<32x128xf32>, vector<8x128xf32> -> vector<8x128xf32>
    %47 = vector.extract_strided_slice %24 {offsets = [8, 0], sizes = [8, 128], strides = [1, 1]} : vector<64x128xf32> to vector<8x128xf32>
    %48 = arith.addf %46, %47 : vector<8x128xf32>
    %49 = arith.negf %48 : vector<8x128xf32>
    %50 = math.exp %49 : vector<8x128xf32>
    %cst_29 = arith.constant 1.000000e+00 : f32
    %51 = vector.broadcast %cst_29 : f32 to vector<8x128xf32>
    %52 = arith.addf %51, %50 : vector<8x128xf32>
    %53 = arith.divf %51, %52 : vector<8x128xf32>
    %54 = math.tanh %48 : vector<8x128xf32>
    %55 = vector.extract_strided_slice %53 {offsets = [0, 0], sizes = [8, 32], strides = [1, 1]} : vector<8x128xf32> to vector<8x32xf32>
    %56 = vector.extract_strided_slice %53 {offsets = [0, 32], sizes = [8, 32], strides = [1, 1]} : vector<8x128xf32> to vector<8x32xf32>
    %57 = vector.extract_strided_slice %54 {offsets = [0, 64], sizes = [8, 32], strides = [1, 1]} : vector<8x128xf32> to vector<8x32xf32>
    %58 = vector.extract_strided_slice %53 {offsets = [0, 96], sizes = [8, 32], strides = [1, 1]} : vector<8x128xf32> to vector<8x32xf32>
    %59 = arith.mulf %56, %43 : vector<8x32xf32>
    %60 = arith.mulf %55, %57 : vector<8x32xf32>
    %61 = arith.addf %59, %60 : vector<8x32xf32>
    %62 = math.tanh %61 : vector<8x32xf32>
    %63 = arith.mulf %58, %62 : vector<8x32xf32>
    %cst_30 = arith.constant dense<0.000000e+00> : vector<8x128xf32>
    %64 = tpu.matmul %63, %25, %cst_30 {dimension_numbers = #tpu.dot_dimension_numbers<[1], [0], [0], [1], [0, 0, 1, 1], [], []>} : vector<8x32xf32>, vector<32x128xf32>, vector<8x128xf32> -> vector<8x128xf32>
    %65 = vector.extract_strided_slice %24 {offsets = [16, 0], sizes = [8, 128], strides = [1, 1]} : vector<64x128xf32> to vector<8x128xf32>
    %66 = arith.addf %64, %65 : vector<8x128xf32>
    %67 = arith.negf %66 : vector<8x128xf32>
    %68 = math.exp %67 : vector<8x128xf32>
    %cst_31 = arith.constant 1.000000e+00 : f32
    %69 = vector.broadcast %cst_31 : f32 to vector<8x128xf32>
    %70 = arith.addf %69, %68 : vector<8x128xf32>
    %71 = arith.divf %69, %70 : vector<8x128xf32>
    %72 = math.tanh %66 : vector<8x128xf32>
    %73 = vector.extract_strided_slice %71 {offsets = [0, 0], sizes = [8, 32], strides = [1, 1]} : vector<8x128xf32> to vector<8x32xf32>
    %74 = vector.extract_strided_slice %71 {offsets = [0, 32], sizes = [8, 32], strides = [1, 1]} : vector<8x128xf32> to vector<8x32xf32>
    %75 = vector.extract_strided_slice %72 {offsets = [0, 64], sizes = [8, 32], strides = [1, 1]} : vector<8x128xf32> to vector<8x32xf32>
    %76 = vector.extract_strided_slice %71 {offsets = [0, 96], sizes = [8, 32], strides = [1, 1]} : vector<8x128xf32> to vector<8x32xf32>
    %77 = arith.mulf %74, %61 : vector<8x32xf32>
    %78 = arith.mulf %73, %75 : vector<8x32xf32>
    %79 = arith.addf %77, %78 : vector<8x32xf32>
    %80 = math.tanh %79 : vector<8x32xf32>
    %81 = arith.mulf %76, %80 : vector<8x32xf32>
    %cst_32 = arith.constant dense<0.000000e+00> : vector<8x128xf32>
    %82 = tpu.matmul %81, %25, %cst_32 {dimension_numbers = #tpu.dot_dimension_numbers<[1], [0], [0], [1], [0, 0, 1, 1], [], []>} : vector<8x32xf32>, vector<32x128xf32>, vector<8x128xf32> -> vector<8x128xf32>
    %83 = vector.extract_strided_slice %24 {offsets = [24, 0], sizes = [8, 128], strides = [1, 1]} : vector<64x128xf32> to vector<8x128xf32>
    %84 = arith.addf %82, %83 : vector<8x128xf32>
    %85 = arith.negf %84 : vector<8x128xf32>
    %86 = math.exp %85 : vector<8x128xf32>
    %cst_33 = arith.constant 1.000000e+00 : f32
    %87 = vector.broadcast %cst_33 : f32 to vector<8x128xf32>
    %88 = arith.addf %87, %86 : vector<8x128xf32>
    %89 = arith.divf %87, %88 : vector<8x128xf32>
    %90 = math.tanh %84 : vector<8x128xf32>
    %91 = vector.extract_strided_slice %89 {offsets = [0, 0], sizes = [8, 32], strides = [1, 1]} : vector<8x128xf32> to vector<8x32xf32>
    %92 = vector.extract_strided_slice %89 {offsets = [0, 32], sizes = [8, 32], strides = [1, 1]} : vector<8x128xf32> to vector<8x32xf32>
    %93 = vector.extract_strided_slice %90 {offsets = [0, 64], sizes = [8, 32], strides = [1, 1]} : vector<8x128xf32> to vector<8x32xf32>
    %94 = vector.extract_strided_slice %89 {offsets = [0, 96], sizes = [8, 32], strides = [1, 1]} : vector<8x128xf32> to vector<8x32xf32>
    %95 = arith.mulf %92, %79 : vector<8x32xf32>
    %96 = arith.mulf %91, %93 : vector<8x32xf32>
    %97 = arith.addf %95, %96 : vector<8x32xf32>
    %98 = math.tanh %97 : vector<8x32xf32>
    %99 = arith.mulf %94, %98 : vector<8x32xf32>
    %cst_34 = arith.constant dense<0.000000e+00> : vector<8x128xf32>
    %100 = tpu.matmul %99, %25, %cst_34 {dimension_numbers = #tpu.dot_dimension_numbers<[1], [0], [0], [1], [0, 0, 1, 1], [], []>} : vector<8x32xf32>, vector<32x128xf32>, vector<8x128xf32> -> vector<8x128xf32>
    %101 = vector.extract_strided_slice %24 {offsets = [32, 0], sizes = [8, 128], strides = [1, 1]} : vector<64x128xf32> to vector<8x128xf32>
    %102 = arith.addf %100, %101 : vector<8x128xf32>
    %103 = arith.negf %102 : vector<8x128xf32>
    %104 = math.exp %103 : vector<8x128xf32>
    %cst_35 = arith.constant 1.000000e+00 : f32
    %105 = vector.broadcast %cst_35 : f32 to vector<8x128xf32>
    %106 = arith.addf %105, %104 : vector<8x128xf32>
    %107 = arith.divf %105, %106 : vector<8x128xf32>
    %108 = math.tanh %102 : vector<8x128xf32>
    %109 = vector.extract_strided_slice %107 {offsets = [0, 0], sizes = [8, 32], strides = [1, 1]} : vector<8x128xf32> to vector<8x32xf32>
    %110 = vector.extract_strided_slice %107 {offsets = [0, 32], sizes = [8, 32], strides = [1, 1]} : vector<8x128xf32> to vector<8x32xf32>
    %111 = vector.extract_strided_slice %108 {offsets = [0, 64], sizes = [8, 32], strides = [1, 1]} : vector<8x128xf32> to vector<8x32xf32>
    %112 = vector.extract_strided_slice %107 {offsets = [0, 96], sizes = [8, 32], strides = [1, 1]} : vector<8x128xf32> to vector<8x32xf32>
    %113 = arith.mulf %110, %97 : vector<8x32xf32>
    %114 = arith.mulf %109, %111 : vector<8x32xf32>
    %115 = arith.addf %113, %114 : vector<8x32xf32>
    %116 = math.tanh %115 : vector<8x32xf32>
    %117 = arith.mulf %112, %116 : vector<8x32xf32>
    %cst_36 = arith.constant dense<0.000000e+00> : vector<8x128xf32>
    %118 = tpu.matmul %117, %25, %cst_36 {dimension_numbers = #tpu.dot_dimension_numbers<[1], [0], [0], [1], [0, 0, 1, 1], [], []>} : vector<8x32xf32>, vector<32x128xf32>, vector<8x128xf32> -> vector<8x128xf32>
    %119 = vector.extract_strided_slice %24 {offsets = [40, 0], sizes = [8, 128], strides = [1, 1]} : vector<64x128xf32> to vector<8x128xf32>
    %120 = arith.addf %118, %119 : vector<8x128xf32>
    %121 = arith.negf %120 : vector<8x128xf32>
    %122 = math.exp %121 : vector<8x128xf32>
    %cst_37 = arith.constant 1.000000e+00 : f32
    %123 = vector.broadcast %cst_37 : f32 to vector<8x128xf32>
    %124 = arith.addf %123, %122 : vector<8x128xf32>
    %125 = arith.divf %123, %124 : vector<8x128xf32>
    %126 = math.tanh %120 : vector<8x128xf32>
    %127 = vector.extract_strided_slice %125 {offsets = [0, 0], sizes = [8, 32], strides = [1, 1]} : vector<8x128xf32> to vector<8x32xf32>
    %128 = vector.extract_strided_slice %125 {offsets = [0, 32], sizes = [8, 32], strides = [1, 1]} : vector<8x128xf32> to vector<8x32xf32>
    %129 = vector.extract_strided_slice %126 {offsets = [0, 64], sizes = [8, 32], strides = [1, 1]} : vector<8x128xf32> to vector<8x32xf32>
    %130 = vector.extract_strided_slice %125 {offsets = [0, 96], sizes = [8, 32], strides = [1, 1]} : vector<8x128xf32> to vector<8x32xf32>
    %131 = arith.mulf %128, %115 : vector<8x32xf32>
    %132 = arith.mulf %127, %129 : vector<8x32xf32>
    %133 = arith.addf %131, %132 : vector<8x32xf32>
    %134 = math.tanh %133 : vector<8x32xf32>
    %135 = arith.mulf %130, %134 : vector<8x32xf32>
    %cst_38 = arith.constant dense<0.000000e+00> : vector<8x128xf32>
    %136 = tpu.matmul %135, %25, %cst_38 {dimension_numbers = #tpu.dot_dimension_numbers<[1], [0], [0], [1], [0, 0, 1, 1], [], []>} : vector<8x32xf32>, vector<32x128xf32>, vector<8x128xf32> -> vector<8x128xf32>
    %137 = vector.extract_strided_slice %24 {offsets = [48, 0], sizes = [8, 128], strides = [1, 1]} : vector<64x128xf32> to vector<8x128xf32>
    %138 = arith.addf %136, %137 : vector<8x128xf32>
    %139 = arith.negf %138 : vector<8x128xf32>
    %140 = math.exp %139 : vector<8x128xf32>
    %cst_39 = arith.constant 1.000000e+00 : f32
    %141 = vector.broadcast %cst_39 : f32 to vector<8x128xf32>
    %142 = arith.addf %141, %140 : vector<8x128xf32>
    %143 = arith.divf %141, %142 : vector<8x128xf32>
    %144 = math.tanh %138 : vector<8x128xf32>
    %145 = vector.extract_strided_slice %143 {offsets = [0, 0], sizes = [8, 32], strides = [1, 1]} : vector<8x128xf32> to vector<8x32xf32>
    %146 = vector.extract_strided_slice %143 {offsets = [0, 32], sizes = [8, 32], strides = [1, 1]} : vector<8x128xf32> to vector<8x32xf32>
    %147 = vector.extract_strided_slice %144 {offsets = [0, 64], sizes = [8, 32], strides = [1, 1]} : vector<8x128xf32> to vector<8x32xf32>
    %148 = vector.extract_strided_slice %143 {offsets = [0, 96], sizes = [8, 32], strides = [1, 1]} : vector<8x128xf32> to vector<8x32xf32>
    %149 = arith.mulf %146, %133 : vector<8x32xf32>
    %150 = arith.mulf %145, %147 : vector<8x32xf32>
    %151 = arith.addf %149, %150 : vector<8x32xf32>
    %152 = math.tanh %151 : vector<8x32xf32>
    %153 = arith.mulf %148, %152 : vector<8x32xf32>
    %cst_40 = arith.constant dense<0.000000e+00> : vector<8x128xf32>
    %154 = tpu.matmul %153, %25, %cst_40 {dimension_numbers = #tpu.dot_dimension_numbers<[1], [0], [0], [1], [0, 0, 1, 1], [], []>} : vector<8x32xf32>, vector<32x128xf32>, vector<8x128xf32> -> vector<8x128xf32>
    %155 = vector.extract_strided_slice %24 {offsets = [56, 0], sizes = [8, 128], strides = [1, 1]} : vector<64x128xf32> to vector<8x128xf32>
    %156 = arith.addf %154, %155 : vector<8x128xf32>
    %157 = arith.negf %156 : vector<8x128xf32>
    %158 = math.exp %157 : vector<8x128xf32>
    %cst_41 = arith.constant 1.000000e+00 : f32
    %159 = vector.broadcast %cst_41 : f32 to vector<8x128xf32>
    %160 = arith.addf %159, %158 : vector<8x128xf32>
    %161 = arith.divf %159, %160 : vector<8x128xf32>
    %162 = math.tanh %156 : vector<8x128xf32>
    %163 = vector.extract_strided_slice %161 {offsets = [0, 0], sizes = [8, 32], strides = [1, 1]} : vector<8x128xf32> to vector<8x32xf32>
    %164 = vector.extract_strided_slice %161 {offsets = [0, 32], sizes = [8, 32], strides = [1, 1]} : vector<8x128xf32> to vector<8x32xf32>
    %165 = vector.extract_strided_slice %162 {offsets = [0, 64], sizes = [8, 32], strides = [1, 1]} : vector<8x128xf32> to vector<8x32xf32>
    %166 = vector.extract_strided_slice %161 {offsets = [0, 96], sizes = [8, 32], strides = [1, 1]} : vector<8x128xf32> to vector<8x32xf32>
    %167 = arith.mulf %164, %151 : vector<8x32xf32>
    %168 = arith.mulf %163, %165 : vector<8x32xf32>
    %169 = arith.addf %167, %168 : vector<8x32xf32>
    %170 = math.tanh %169 : vector<8x32xf32>
    %171 = arith.mulf %166, %170 : vector<8x32xf32>
    %172 = tpu.concatenate %45, %63, %81, %99, %117, %135, %153, %171 in 0 : vector<8x32xf32>, vector<8x32xf32>, vector<8x32xf32>, vector<8x32xf32>, vector<8x32xf32>, vector<8x32xf32>, vector<8x32xf32>, vector<8x32xf32> -> vector<64x32xf32>
    %c0_42 = arith.constant 0 : index
    %c0_43 = arith.constant 0 : index
    %173 = vector.load %arg6[%c0_42, %c0_43] : memref<32x128xf32, #tpu.memory_space<vmem>>, vector<32x128xf32>
    %cst_44 = arith.constant dense<0.000000e+00> : vector<64x128xf32>
    %174 = tpu.matmul %172, %173, %cst_44 {dimension_numbers = #tpu.dot_dimension_numbers<[1], [0], [0], [1], [0, 0, 1, 1], [], []>} : vector<64x32xf32>, vector<32x128xf32>, vector<64x128xf32> -> vector<64x128xf32>
    %c0_45 = arith.constant 0 : index
    %c0_46 = arith.constant 0 : index
    %175 = vector.load %arg8[%c0_45, %c0_46] : memref<1x128xf32, #tpu.memory_space<vmem>>, vector<1x128xf32>
    %176 = vector.broadcast %175 : vector<1x128xf32> to vector<64x128xf32>
    %177 = arith.addf %174, %176 : vector<64x128xf32>
    %c0_47 = arith.constant 0 : index
    %c0_48 = arith.constant 0 : index
    %178 = vector.load %arg7[%c0_47, %c0_48] : memref<32x128xf32, #tpu.memory_space<vmem>>, vector<32x128xf32>
    %cst_49 = arith.constant 0.000000e+00 : f32
    %179 = vector.broadcast %cst_49 : f32 to vector<8x32xf32>
    %cst_50 = arith.constant 0.000000e+00 : f32
    %180 = vector.broadcast %cst_50 : f32 to vector<8x32xf32>
    %cst_51 = arith.constant dense<0.000000e+00> : vector<8x128xf32>
    %181 = tpu.matmul %179, %178, %cst_51 {dimension_numbers = #tpu.dot_dimension_numbers<[1], [0], [0], [1], [0, 0, 1, 1], [], []>} : vector<8x32xf32>, vector<32x128xf32>, vector<8x128xf32> -> vector<8x128xf32>
    %182 = vector.extract_strided_slice %177 {offsets = [0, 0], sizes = [8, 128], strides = [1, 1]} : vector<64x128xf32> to vector<8x128xf32>
    %183 = arith.addf %181, %182 : vector<8x128xf32>
    %184 = arith.negf %183 : vector<8x128xf32>
    %185 = math.exp %184 : vector<8x128xf32>
    %cst_52 = arith.constant 1.000000e+00 : f32
    %186 = vector.broadcast %cst_52 : f32 to vector<8x128xf32>
    %187 = arith.addf %186, %185 : vector<8x128xf32>
    %188 = arith.divf %186, %187 : vector<8x128xf32>
    %189 = math.tanh %183 : vector<8x128xf32>
    %190 = vector.extract_strided_slice %188 {offsets = [0, 0], sizes = [8, 32], strides = [1, 1]} : vector<8x128xf32> to vector<8x32xf32>
    %191 = vector.extract_strided_slice %188 {offsets = [0, 32], sizes = [8, 32], strides = [1, 1]} : vector<8x128xf32> to vector<8x32xf32>
    %192 = vector.extract_strided_slice %189 {offsets = [0, 64], sizes = [8, 32], strides = [1, 1]} : vector<8x128xf32> to vector<8x32xf32>
    %193 = vector.extract_strided_slice %188 {offsets = [0, 96], sizes = [8, 32], strides = [1, 1]} : vector<8x128xf32> to vector<8x32xf32>
    %194 = arith.mulf %191, %180 : vector<8x32xf32>
    %195 = arith.mulf %190, %192 : vector<8x32xf32>
    %196 = arith.addf %194, %195 : vector<8x32xf32>
    %197 = math.tanh %196 : vector<8x32xf32>
    %198 = arith.mulf %193, %197 : vector<8x32xf32>
    %199 = arith.mulf %198, %19 : vector<8x32xf32>
    %cst_53 = arith.constant dense<0.000000e+00> : vector<8xf32>
    %200 = vector.multi_reduction <add>, %199, %cst_53 [1] : vector<8x32xf32> to vector<8xf32>
    %201 = vector.shape_cast %200 : vector<8xf32> to vector<8x1xf32>
    %cst_54 = arith.constant dense<0.000000e+00> : vector<8x128xf32>
    %202 = tpu.matmul %198, %178, %cst_54 {dimension_numbers = #tpu.dot_dimension_numbers<[1], [0], [0], [1], [0, 0, 1, 1], [], []>} : vector<8x32xf32>, vector<32x128xf32>, vector<8x128xf32> -> vector<8x128xf32>
    %203 = vector.extract_strided_slice %177 {offsets = [8, 0], sizes = [8, 128], strides = [1, 1]} : vector<64x128xf32> to vector<8x128xf32>
    %204 = arith.addf %202, %203 : vector<8x128xf32>
    %205 = arith.negf %204 : vector<8x128xf32>
    %206 = math.exp %205 : vector<8x128xf32>
    %cst_55 = arith.constant 1.000000e+00 : f32
    %207 = vector.broadcast %cst_55 : f32 to vector<8x128xf32>
    %208 = arith.addf %207, %206 : vector<8x128xf32>
    %209 = arith.divf %207, %208 : vector<8x128xf32>
    %210 = math.tanh %204 : vector<8x128xf32>
    %211 = vector.extract_strided_slice %209 {offsets = [0, 0], sizes = [8, 32], strides = [1, 1]} : vector<8x128xf32> to vector<8x32xf32>
    %212 = vector.extract_strided_slice %209 {offsets = [0, 32], sizes = [8, 32], strides = [1, 1]} : vector<8x128xf32> to vector<8x32xf32>
    %213 = vector.extract_strided_slice %210 {offsets = [0, 64], sizes = [8, 32], strides = [1, 1]} : vector<8x128xf32> to vector<8x32xf32>
    %214 = vector.extract_strided_slice %209 {offsets = [0, 96], sizes = [8, 32], strides = [1, 1]} : vector<8x128xf32> to vector<8x32xf32>
    %215 = arith.mulf %212, %196 : vector<8x32xf32>
    %216 = arith.mulf %211, %213 : vector<8x32xf32>
    %217 = arith.addf %215, %216 : vector<8x32xf32>
    %218 = math.tanh %217 : vector<8x32xf32>
    %219 = arith.mulf %214, %218 : vector<8x32xf32>
    %220 = arith.mulf %219, %19 : vector<8x32xf32>
    %cst_56 = arith.constant dense<0.000000e+00> : vector<8xf32>
    %221 = vector.multi_reduction <add>, %220, %cst_56 [1] : vector<8x32xf32> to vector<8xf32>
    %222 = vector.shape_cast %221 : vector<8xf32> to vector<8x1xf32>
    %cst_57 = arith.constant dense<0.000000e+00> : vector<8x128xf32>
    %223 = tpu.matmul %219, %178, %cst_57 {dimension_numbers = #tpu.dot_dimension_numbers<[1], [0], [0], [1], [0, 0, 1, 1], [], []>} : vector<8x32xf32>, vector<32x128xf32>, vector<8x128xf32> -> vector<8x128xf32>
    %224 = vector.extract_strided_slice %177 {offsets = [16, 0], sizes = [8, 128], strides = [1, 1]} : vector<64x128xf32> to vector<8x128xf32>
    %225 = arith.addf %223, %224 : vector<8x128xf32>
    %226 = arith.negf %225 : vector<8x128xf32>
    %227 = math.exp %226 : vector<8x128xf32>
    %cst_58 = arith.constant 1.000000e+00 : f32
    %228 = vector.broadcast %cst_58 : f32 to vector<8x128xf32>
    %229 = arith.addf %228, %227 : vector<8x128xf32>
    %230 = arith.divf %228, %229 : vector<8x128xf32>
    %231 = math.tanh %225 : vector<8x128xf32>
    %232 = vector.extract_strided_slice %230 {offsets = [0, 0], sizes = [8, 32], strides = [1, 1]} : vector<8x128xf32> to vector<8x32xf32>
    %233 = vector.extract_strided_slice %230 {offsets = [0, 32], sizes = [8, 32], strides = [1, 1]} : vector<8x128xf32> to vector<8x32xf32>
    %234 = vector.extract_strided_slice %231 {offsets = [0, 64], sizes = [8, 32], strides = [1, 1]} : vector<8x128xf32> to vector<8x32xf32>
    %235 = vector.extract_strided_slice %230 {offsets = [0, 96], sizes = [8, 32], strides = [1, 1]} : vector<8x128xf32> to vector<8x32xf32>
    %236 = arith.mulf %233, %217 : vector<8x32xf32>
    %237 = arith.mulf %232, %234 : vector<8x32xf32>
    %238 = arith.addf %236, %237 : vector<8x32xf32>
    %239 = math.tanh %238 : vector<8x32xf32>
    %240 = arith.mulf %235, %239 : vector<8x32xf32>
    %241 = arith.mulf %240, %19 : vector<8x32xf32>
    %cst_59 = arith.constant dense<0.000000e+00> : vector<8xf32>
    %242 = vector.multi_reduction <add>, %241, %cst_59 [1] : vector<8x32xf32> to vector<8xf32>
    %243 = vector.shape_cast %242 : vector<8xf32> to vector<8x1xf32>
    %cst_60 = arith.constant dense<0.000000e+00> : vector<8x128xf32>
    %244 = tpu.matmul %240, %178, %cst_60 {dimension_numbers = #tpu.dot_dimension_numbers<[1], [0], [0], [1], [0, 0, 1, 1], [], []>} : vector<8x32xf32>, vector<32x128xf32>, vector<8x128xf32> -> vector<8x128xf32>
    %245 = vector.extract_strided_slice %177 {offsets = [24, 0], sizes = [8, 128], strides = [1, 1]} : vector<64x128xf32> to vector<8x128xf32>
    %246 = arith.addf %244, %245 : vector<8x128xf32>
    %247 = arith.negf %246 : vector<8x128xf32>
    %248 = math.exp %247 : vector<8x128xf32>
    %cst_61 = arith.constant 1.000000e+00 : f32
    %249 = vector.broadcast %cst_61 : f32 to vector<8x128xf32>
    %250 = arith.addf %249, %248 : vector<8x128xf32>
    %251 = arith.divf %249, %250 : vector<8x128xf32>
    %252 = math.tanh %246 : vector<8x128xf32>
    %253 = vector.extract_strided_slice %251 {offsets = [0, 0], sizes = [8, 32], strides = [1, 1]} : vector<8x128xf32> to vector<8x32xf32>
    %254 = vector.extract_strided_slice %251 {offsets = [0, 32], sizes = [8, 32], strides = [1, 1]} : vector<8x128xf32> to vector<8x32xf32>
    %255 = vector.extract_strided_slice %252 {offsets = [0, 64], sizes = [8, 32], strides = [1, 1]} : vector<8x128xf32> to vector<8x32xf32>
    %256 = vector.extract_strided_slice %251 {offsets = [0, 96], sizes = [8, 32], strides = [1, 1]} : vector<8x128xf32> to vector<8x32xf32>
    %257 = arith.mulf %254, %238 : vector<8x32xf32>
    %258 = arith.mulf %253, %255 : vector<8x32xf32>
    %259 = arith.addf %257, %258 : vector<8x32xf32>
    %260 = math.tanh %259 : vector<8x32xf32>
    %261 = arith.mulf %256, %260 : vector<8x32xf32>
    %262 = arith.mulf %261, %19 : vector<8x32xf32>
    %cst_62 = arith.constant dense<0.000000e+00> : vector<8xf32>
    %263 = vector.multi_reduction <add>, %262, %cst_62 [1] : vector<8x32xf32> to vector<8xf32>
    %264 = vector.shape_cast %263 : vector<8xf32> to vector<8x1xf32>
    %cst_63 = arith.constant dense<0.000000e+00> : vector<8x128xf32>
    %265 = tpu.matmul %261, %178, %cst_63 {dimension_numbers = #tpu.dot_dimension_numbers<[1], [0], [0], [1], [0, 0, 1, 1], [], []>} : vector<8x32xf32>, vector<32x128xf32>, vector<8x128xf32> -> vector<8x128xf32>
    %266 = vector.extract_strided_slice %177 {offsets = [32, 0], sizes = [8, 128], strides = [1, 1]} : vector<64x128xf32> to vector<8x128xf32>
    %267 = arith.addf %265, %266 : vector<8x128xf32>
    %268 = arith.negf %267 : vector<8x128xf32>
    %269 = math.exp %268 : vector<8x128xf32>
    %cst_64 = arith.constant 1.000000e+00 : f32
    %270 = vector.broadcast %cst_64 : f32 to vector<8x128xf32>
    %271 = arith.addf %270, %269 : vector<8x128xf32>
    %272 = arith.divf %270, %271 : vector<8x128xf32>
    %273 = math.tanh %267 : vector<8x128xf32>
    %274 = vector.extract_strided_slice %272 {offsets = [0, 0], sizes = [8, 32], strides = [1, 1]} : vector<8x128xf32> to vector<8x32xf32>
    %275 = vector.extract_strided_slice %272 {offsets = [0, 32], sizes = [8, 32], strides = [1, 1]} : vector<8x128xf32> to vector<8x32xf32>
    %276 = vector.extract_strided_slice %273 {offsets = [0, 64], sizes = [8, 32], strides = [1, 1]} : vector<8x128xf32> to vector<8x32xf32>
    %277 = vector.extract_strided_slice %272 {offsets = [0, 96], sizes = [8, 32], strides = [1, 1]} : vector<8x128xf32> to vector<8x32xf32>
    %278 = arith.mulf %275, %259 : vector<8x32xf32>
    %279 = arith.mulf %274, %276 : vector<8x32xf32>
    %280 = arith.addf %278, %279 : vector<8x32xf32>
    %281 = math.tanh %280 : vector<8x32xf32>
    %282 = arith.mulf %277, %281 : vector<8x32xf32>
    %283 = arith.mulf %282, %19 : vector<8x32xf32>
    %cst_65 = arith.constant dense<0.000000e+00> : vector<8xf32>
    %284 = vector.multi_reduction <add>, %283, %cst_65 [1] : vector<8x32xf32> to vector<8xf32>
    %285 = vector.shape_cast %284 : vector<8xf32> to vector<8x1xf32>
    %cst_66 = arith.constant dense<0.000000e+00> : vector<8x128xf32>
    %286 = tpu.matmul %282, %178, %cst_66 {dimension_numbers = #tpu.dot_dimension_numbers<[1], [0], [0], [1], [0, 0, 1, 1], [], []>} : vector<8x32xf32>, vector<32x128xf32>, vector<8x128xf32> -> vector<8x128xf32>
    %287 = vector.extract_strided_slice %177 {offsets = [40, 0], sizes = [8, 128], strides = [1, 1]} : vector<64x128xf32> to vector<8x128xf32>
    %288 = arith.addf %286, %287 : vector<8x128xf32>
    %289 = arith.negf %288 : vector<8x128xf32>
    %290 = math.exp %289 : vector<8x128xf32>
    %cst_67 = arith.constant 1.000000e+00 : f32
    %291 = vector.broadcast %cst_67 : f32 to vector<8x128xf32>
    %292 = arith.addf %291, %290 : vector<8x128xf32>
    %293 = arith.divf %291, %292 : vector<8x128xf32>
    %294 = math.tanh %288 : vector<8x128xf32>
    %295 = vector.extract_strided_slice %293 {offsets = [0, 0], sizes = [8, 32], strides = [1, 1]} : vector<8x128xf32> to vector<8x32xf32>
    %296 = vector.extract_strided_slice %293 {offsets = [0, 32], sizes = [8, 32], strides = [1, 1]} : vector<8x128xf32> to vector<8x32xf32>
    %297 = vector.extract_strided_slice %294 {offsets = [0, 64], sizes = [8, 32], strides = [1, 1]} : vector<8x128xf32> to vector<8x32xf32>
    %298 = vector.extract_strided_slice %293 {offsets = [0, 96], sizes = [8, 32], strides = [1, 1]} : vector<8x128xf32> to vector<8x32xf32>
    %299 = arith.mulf %296, %280 : vector<8x32xf32>
    %300 = arith.mulf %295, %297 : vector<8x32xf32>
    %301 = arith.addf %299, %300 : vector<8x32xf32>
    %302 = math.tanh %301 : vector<8x32xf32>
    %303 = arith.mulf %298, %302 : vector<8x32xf32>
    %304 = arith.mulf %303, %19 : vector<8x32xf32>
    %cst_68 = arith.constant dense<0.000000e+00> : vector<8xf32>
    %305 = vector.multi_reduction <add>, %304, %cst_68 [1] : vector<8x32xf32> to vector<8xf32>
    %306 = vector.shape_cast %305 : vector<8xf32> to vector<8x1xf32>
    %cst_69 = arith.constant dense<0.000000e+00> : vector<8x128xf32>
    %307 = tpu.matmul %303, %178, %cst_69 {dimension_numbers = #tpu.dot_dimension_numbers<[1], [0], [0], [1], [0, 0, 1, 1], [], []>} : vector<8x32xf32>, vector<32x128xf32>, vector<8x128xf32> -> vector<8x128xf32>
    %308 = vector.extract_strided_slice %177 {offsets = [48, 0], sizes = [8, 128], strides = [1, 1]} : vector<64x128xf32> to vector<8x128xf32>
    %309 = arith.addf %307, %308 : vector<8x128xf32>
    %310 = arith.negf %309 : vector<8x128xf32>
    %311 = math.exp %310 : vector<8x128xf32>
    %cst_70 = arith.constant 1.000000e+00 : f32
    %312 = vector.broadcast %cst_70 : f32 to vector<8x128xf32>
    %313 = arith.addf %312, %311 : vector<8x128xf32>
    %314 = arith.divf %312, %313 : vector<8x128xf32>
    %315 = math.tanh %309 : vector<8x128xf32>
    %316 = vector.extract_strided_slice %314 {offsets = [0, 0], sizes = [8, 32], strides = [1, 1]} : vector<8x128xf32> to vector<8x32xf32>
    %317 = vector.extract_strided_slice %314 {offsets = [0, 32], sizes = [8, 32], strides = [1, 1]} : vector<8x128xf32> to vector<8x32xf32>
    %318 = vector.extract_strided_slice %315 {offsets = [0, 64], sizes = [8, 32], strides = [1, 1]} : vector<8x128xf32> to vector<8x32xf32>
    %319 = vector.extract_strided_slice %314 {offsets = [0, 96], sizes = [8, 32], strides = [1, 1]} : vector<8x128xf32> to vector<8x32xf32>
    %320 = arith.mulf %317, %301 : vector<8x32xf32>
    %321 = arith.mulf %316, %318 : vector<8x32xf32>
    %322 = arith.addf %320, %321 : vector<8x32xf32>
    %323 = math.tanh %322 : vector<8x32xf32>
    %324 = arith.mulf %319, %323 : vector<8x32xf32>
    %325 = arith.mulf %324, %19 : vector<8x32xf32>
    %cst_71 = arith.constant dense<0.000000e+00> : vector<8xf32>
    %326 = vector.multi_reduction <add>, %325, %cst_71 [1] : vector<8x32xf32> to vector<8xf32>
    %327 = vector.shape_cast %326 : vector<8xf32> to vector<8x1xf32>
    %cst_72 = arith.constant dense<0.000000e+00> : vector<8x128xf32>
    %328 = tpu.matmul %324, %178, %cst_72 {dimension_numbers = #tpu.dot_dimension_numbers<[1], [0], [0], [1], [0, 0, 1, 1], [], []>} : vector<8x32xf32>, vector<32x128xf32>, vector<8x128xf32> -> vector<8x128xf32>
    %329 = vector.extract_strided_slice %177 {offsets = [56, 0], sizes = [8, 128], strides = [1, 1]} : vector<64x128xf32> to vector<8x128xf32>
    %330 = arith.addf %328, %329 : vector<8x128xf32>
    %331 = arith.negf %330 : vector<8x128xf32>
    %332 = math.exp %331 : vector<8x128xf32>
    %cst_73 = arith.constant 1.000000e+00 : f32
    %333 = vector.broadcast %cst_73 : f32 to vector<8x128xf32>
    %334 = arith.addf %333, %332 : vector<8x128xf32>
    %335 = arith.divf %333, %334 : vector<8x128xf32>
    %336 = math.tanh %330 : vector<8x128xf32>
    %337 = vector.extract_strided_slice %335 {offsets = [0, 0], sizes = [8, 32], strides = [1, 1]} : vector<8x128xf32> to vector<8x32xf32>
    %338 = vector.extract_strided_slice %335 {offsets = [0, 32], sizes = [8, 32], strides = [1, 1]} : vector<8x128xf32> to vector<8x32xf32>
    %339 = vector.extract_strided_slice %336 {offsets = [0, 64], sizes = [8, 32], strides = [1, 1]} : vector<8x128xf32> to vector<8x32xf32>
    %340 = vector.extract_strided_slice %335 {offsets = [0, 96], sizes = [8, 32], strides = [1, 1]} : vector<8x128xf32> to vector<8x32xf32>
    %341 = arith.mulf %338, %322 : vector<8x32xf32>
    %342 = arith.mulf %337, %339 : vector<8x32xf32>
    %343 = arith.addf %341, %342 : vector<8x32xf32>
    %344 = math.tanh %343 : vector<8x32xf32>
    %345 = arith.mulf %340, %344 : vector<8x32xf32>
    %346 = arith.mulf %345, %19 : vector<8x32xf32>
    %cst_74 = arith.constant dense<0.000000e+00> : vector<8xf32>
    %347 = vector.multi_reduction <add>, %346, %cst_74 [1] : vector<8x32xf32> to vector<8xf32>
    %348 = vector.shape_cast %347 : vector<8xf32> to vector<8x1xf32>
    %349 = tpu.concatenate %201, %222, %243, %264, %285, %306, %327, %348 in 1 : vector<8x1xf32>, vector<8x1xf32>, vector<8x1xf32>, vector<8x1xf32>, vector<8x1xf32>, vector<8x1xf32>, vector<8x1xf32>, vector<8x1xf32> -> vector<8x8xf32>
    %c0_75 = arith.constant 0 : index
    %c0_76 = arith.constant 0 : index
    %350 = vector.load %arg10[%c0_75, %c0_76] : memref<1x1xf32, #tpu.memory_space<vmem>>, vector<1x1xf32>
    %351 = vector.broadcast %350 : vector<1x1xf32> to vector<8x8xf32>
    %352 = arith.addf %349, %351 : vector<8x8xf32>
    %c0_77 = arith.constant 0 : index
    %c0_78 = arith.constant 0 : index
    %353 = vector.load %arg2[%c0_77, %c0_78] : memref<8x8xf32, #tpu.memory_space<vmem>>, vector<8x8xf32>
    %354 = arith.addf %352, %353 : vector<8x8xf32>
    %c0_79 = arith.constant 0 : index
    %c0_80 = arith.constant 0 : index
    %355 = vector.load %arg11[%c0_79, %c0_80] : memref<8x8xf32, #tpu.memory_space<vmem>>, vector<8x8xf32>
    tpu.vector_store %arg11[%c0_79, %c0_80], %354 {strides = array<i32>} : memref<8x8xf32, #tpu.memory_space<vmem>>, vector<8x8xf32>,
    return
  }
  func.func @transform_0(%arg0: i32) -> (i32, i32, i32) {
    %c0_i32 = arith.constant 0 : i32
    %c0_i32_0 = arith.constant 0 : i32
    %c0_i32_1 = arith.constant 0 : i32
    return %c0_i32, %arg0, %c0_i32_0 : i32, i32, i32
  }
  func.func @transform_1(%arg0: i32) -> (i32, i32) {
    %c0_i32 = arith.constant 0 : i32
    %c0_i32_0 = arith.constant 0 : i32
    return %arg0, %c0_i32 : i32, i32
  }
  func.func @transform_2(%arg0: i32) -> (i32, i32) {
    %c0_i32 = arith.constant 0 : i32
    %c0_i32_0 = arith.constant 0 : i32
    %c0_i32_1 = arith.constant 0 : i32
    return %c0_i32, %c0_i32_0 : i32, i32
  }
  func.func @transform_3(%arg0: i32) -> (i32, i32) {
    %c0_i32 = arith.constant 0 : i32
    %c0_i32_0 = arith.constant 0 : i32
    %c0_i32_1 = arith.constant 0 : i32
    return %c0_i32, %c0_i32_0 : i32, i32
  }
  func.func @transform_4(%arg0: i32) -> (i32, i32) {
    %c0_i32 = arith.constant 0 : i32
    %c0_i32_0 = arith.constant 0 : i32
    %c0_i32_1 = arith.constant 0 : i32
    return %c0_i32, %c0_i32_0 : i32, i32
  }
  func.func @transform_5(%arg0: i32) -> (i32, i32) {
    %c0_i32 = arith.constant 0 : i32
    %c0_i32_0 = arith.constant 0 : i32
    %c0_i32_1 = arith.constant 0 : i32
    return %c0_i32, %c0_i32_0 : i32, i32
  }
  func.func @transform_6(%arg0: i32) -> (i32, i32) {
    %c0_i32 = arith.constant 0 : i32
    %c0_i32_0 = arith.constant 0 : i32
    %c0_i32_1 = arith.constant 0 : i32
    return %c0_i32, %c0_i32_0 : i32, i32
  }
  func.func @transform_7(%arg0: i32) -> (i32, i32) {
    %c0_i32 = arith.constant 0 : i32
    %c0_i32_0 = arith.constant 0 : i32
    %c0_i32_1 = arith.constant 0 : i32
    return %c0_i32, %c0_i32_0 : i32, i32
  }
  func.func @transform_8(%arg0: i32) -> (i32, i32) {
    %c0_i32 = arith.constant 0 : i32
    %c0_i32_0 = arith.constant 0 : i32
    %c0_i32_1 = arith.constant 0 : i32
    return %c0_i32, %c0_i32_0 : i32, i32
  }
  func.func @transform_9(%arg0: i32) -> (i32, i32) {
    %c0_i32 = arith.constant 0 : i32
    %c0_i32_0 = arith.constant 0 : i32
    %c0_i32_1 = arith.constant 0 : i32
    return %c0_i32, %c0_i32_0 : i32, i32
  }
  func.func @transform_10(%arg0: i32) -> (i32, i32) {
    %c0_i32 = arith.constant 0 : i32
    %c0_i32_0 = arith.constant 0 : i32
    return %arg0, %c0_i32 : i32, i32
  }
}

</mosaic_0001>

<bundles_post_ra>
// kernel: prices_forward.1
= control target key start
LH: loop header
LB: loop body
LE: loop exit
PB: predicated region body
PF: predicated region fallthrough
CT: control target
= control target key end

     0   :  { %vm60_vm0 = vcmask 64512   ;;  %v1462_v6 = vmov 0.0   ;;  %s1463_s25 = smov 64   ;;  %s1464_s26 = smov 32   ;;  %vm130_vm5 = vcmask 261120   ;;  %s1870_s3 = inlined_call_operand.vmem [shape: f32[32,128], index: 3, kind: input, shape index: {}]   ;;  %s1871_s2 = inlined_call_operand.vmem [shape: f32[8,128], index: 2, kind: input, shape index: {}]   ;;  %s1872_s0 = inlined_call_operand.vmem [shape: f32[8,8,8], index: 0, kind: input, shape index: {}]   ;;  %s1873_s4 = inlined_call_operand.vmem [shape: f32[1,128], index: 4, kind: input, shape index: {}]   ;;  %s1874_s5 = inlined_call_operand.vmem [shape: f32[32,128], index: 5, kind: input, shape index: {}]   ;;  %s1875_s7 = inlined_call_operand.vmem [shape: f32[1,128], index: 7, kind: input, shape index: {}]   ;;  %s1876_s6 = inlined_call_operand.vmem [shape: f32[32,128], index: 6, kind: input, shape index: {}]   ;;  %s1877_s8 = inlined_call_operand.vmem [shape: f32[1,32], index: 8, kind: input, shape index: {}]   ;;  %s1878_s9 = inlined_call_operand.<no memory space> [shape: f32[1,1], index: 9, kind: input, shape index: {}]   ;;  %s1879_s1 = inlined_call_operand.vmem [shape: f32[8,8], index: 1, kind: input, shape index: {}]   ;;  %s1880_s10 = inlined_call_operand.vmem [shape: f32[8,8], index: 10, kind: output, shape index: {}]  }
   0x1   :  { %v1525_v0 = vld [vmem:[%s1870_s3 + $0x18] sm:$0xff]  ;;  %v1530_v1 = vld [vmem:[%s1870_s3 + $0x10] sm:$0xff]  ;;  %v55_v2 = vld [vmem:[%s1871_s2] sm:$0xff]  ;;  %s1465_s17 = smov 96  }
   0x2   :  { %146 = vmatpush.msra.mxu1 %v1525_v0  ;;  %100 = vmatpush.msra.mxu0 %v55_v2  ;;  %v37_v3 = vld [vmem:[%s1872_s0] sm:$0xff]  ;;  %v1542_v4 = vld [vmem:[%s1870_s3 + $0x8] sm:$0xff]  ;;  %v628_v32 = vld [vmem:[%s1874_s5 + $0x18] sm:$0xff] }
   0x3   :  { %1277 = vmatmul.msk.f32.vlgmr.msra.gmra.mxu0 %vm60_vm0, %v37_v3  ;;  %208 = vmatpush.msra.mxu2 %v1525_v0  ;;  %v1550_v5 = vld [vmem:[%s1870_s3] sm:$0xff]  ;;  %v627_v33 = vld [vmem:[%s1874_s5 + $0x10] sm:$0xff]  ;;  %v626_v34 = vld [vmem:[%s1874_s5 + $0x8] sm:$0xff] }
   0x4   :  { %147 = vmatpush.msra.mxu1 %v1530_v1  ;;  %v1573_v7 = vld [vmem:[%s1873_s4] ss:$0 sm:$0xff]  ;;  %650 = vmatpush.msra.mxu3 %v628_v32  ;;  %v1270_v38 = vld [vmem:[%s1872_s0 + $0x8] sm:$0xff]  ;;  %v1271_v2 = vld [vmem:[%s1872_s0 + $0x10] sm:$0xff] }
   0x5   :  { %209 = vmatpush.msra.mxu2 %v1530_v1  ;;  %v625_v35 = vld [vmem:[%s1874_s5] sm:$0xff] }
   0x6   :  { %148 = vmatpush.msra.mxu1 %v1542_v4  ;;  %651 = vmatpush.msra.mxu3 %v627_v33 }
   0x7   :  { %210 = vmatpush.msra.mxu2 %v1542_v4 }
   0x8   :  { %149 = vmatpush.msra.mxu1 %v1550_v5  ;;  %652 = vmatpush.msra.mxu3 %v626_v34  ;;  %v1272_v34 = vld [vmem:[%s1872_s0 + $0x18] sm:$0xff] }
   0x9   :  { %150 = vmatmul.f32.vlgmr.msra.gmra.mxu1 %v1462_v6  ;;  %211 = vmatpush.msra.mxu2 %v1550_v5 }
   0xa   :  { %270 = vmatpush.msrb.mxu1 %v1525_v0  ;;  %653 = vmatpush.msra.mxu3 %v625_v35 }
   0xb   :  { %394 = vmatpush.msrb.mxu2 %v1525_v0  ;;  %1278 = vmatmul.msk.f32.gmra.mxu0 %vm60_vm0, %v1270_v38 }
   0xc   :  { %271 = vmatpush.msrb.mxu1 %v1530_v1 }
   0xd   :  { %395 = vmatpush.msrb.mxu2 %v1530_v1 }
   0xe   :  { %272 = vmatpush.msrb.mxu1 %v1542_v4 }
   0xf   :  { %396 = vmatpush.msrb.mxu2 %v1542_v4 }
  0x10   :  { %273 = vmatpush.msrb.mxu1 %v1550_v5 }
  0x11   :  { %397 = vmatpush.msrb.mxu2 %v1550_v5 }
  0x12   :  { %332 = vmatpush.msra.mxu1 %v1525_v0 }
  0x13   :  { %1279 = vmatmul.msk.f32.gmra.mxu0 %vm60_vm0, %v1271_v2  ;;  %v1273_v2 = vld [vmem:[%s1872_s0 + $0x20] sm:$0xff] }
  0x14   :  { %333 = vmatpush.msra.mxu1 %v1530_v1 }
  0x16   :  { %334 = vmatpush.msra.mxu1 %v1542_v4 }
  0x18   :  { %335 = vmatpush.msra.mxu1 %v1550_v5 }
  0x1b   :  { %1280 = vmatmul.msk.f32.gmra.mxu0 %vm60_vm0, %v1272_v34 }
  0x23   :  { %1281 = vmatmul.msk.f32.gmra.mxu0 %vm60_vm0, %v1273_v2 }
  0x80   :  { %v102_v8 = vpop.f32.mrf.mxu0 }
  0x81   :  { %v103_v9 = vadd.f32 %v1573_v7, %v102_v8 }
  0x86   :  { %v151_v10 = vpop.f32.mrf.mxu1 }
  0x87   :  { %v152_v11 = vadd.f32 %v151_v10, %v103_v9 }
  0x88   :  { %v105_v40 = vpop.f32.mrf.mxu0 }
  0x89   :  { %1333 = vtanh.f32 %v152_v11  ;;  %v1285_v13 = vmul.f32 -1.442695, %v152_v11  ;;  %v106_v41 = vadd.f32 %v1573_v7, %v105_v40 }
  0x8b   :  { %1335 = vpow2.f32 %v1285_v13 }
  0x8f   :  { %v1334_v12 = vpop.eup %1333 }
  0x90   :  { %176 = vrot.lane.b32.xlu0 %v1334_v12, %s1463_s25  ;;  %v108_v10 = vpop.f32.mrf.mxu0 }
  0x91   :  { %v1336_v14 = vpop.eup %1335  ;;  %v109_v11 = vadd.f32 %v1573_v7, %v108_v10 }
  0x92   :  { %v157_v15 = vadd.f32 1.0, %v1336_v14 }
  0x94   :  { %1337 = vrcp.f32 %v157_v15  ;;  %v169_v21 = vand.u32 2147483648, %v157_v15  ;;  %vm163_vm2 = vweird.f32 %v157_v15  ;;  %v167_v22 = vand.u32 2147483647, %v157_v15 }
  0x96   :  { %v170_v24 = vor.u32 1.1754944e-38, %v169_v21  ;;  %vm168_vm4 = vcmp.eq.f32.partialorder %v167_v22, 8.507059e+37 }
  0x98   :  { %v111_v38 = vpop.f32.mrf.mxu0 }
  0x9a   :  { %v1338_v16 = vpop.eup %1337 }
  0x9b   :  { %v159_v17 = vmul.f32 %v1338_v16, %v157_v15  ;;  %vm164_vm1 = vweird.f32 %v1338_v16 }
  0x9c   :  { %vm165_vm3 = vmor %vm163_vm2, %vm164_vm1 }
  0x9d   :  { %v160_v18 = vsub.f32 1.0, %v159_v17 }
  0x9f   :  { %v161_v19 = vmul.f32 %v1338_v16, %v160_v18 }
  0xa1   :  { %v162_v20 = vadd.f32 %v1338_v16, %v161_v19 }
  0xa3   :  { %v166_v23 = vsel %vm165_vm3, %v1338_v16, %v162_v20 }
  0xa4   :  { %v171_v26 = vsel %vm168_vm4, %v170_v24, %v166_v23 }
  0xa5   :  { %v174_v28 = vmul.f32 0.0, %v171_v26 }
 0x102   :  { %v177_v25 = vpop.permute.xlu0 %176 }
 0x103   :  { %v179_v27 = vmul.f32 %v177_v25, %v171_v26 }
 0x105   :  { %181 = vrot.lane.b32.xlu0 %v179_v27, %s1464_s26 }
 0x177   :  { %v182_v29 = vpop.permute.xlu0 %181 }
 0x178   :  { %v184_v30 = vadd.f32 %v182_v29, %v174_v28 }
 0x17a   :  { %1339 = vtanh.f32 %v184_v30 }
 0x180   :  { %v1340_v31 = vpop.eup %1339 }
 0x181   :  { %187 = vrot.lane.b32.xlu1 %v1340_v31, %s1463_s25 }
 0x1f3   :  { %v188_v36 = vpop.permute.xlu1 %187 }
 0x1f4   :  { %v190_v37 = vmul.f32 %v188_v36, %v171_v26 }
 0x1f6   :  { %192 = vrot.lane.b32.xlu1 %v190_v37, %s1464_s26 }
 0x268   :  { %v193_v39 = vpop.permute.xlu1 %192 }
 0x269   :  { %1286 = vmatmul.msk.f32.vlgmr.msra.gmra.mxu2 %vm130_vm5, %v193_v39  ;;  %1300 = vmatmul.msk.f32.vlgmr.msra.gmra.mxu3 %vm130_vm5, %v193_v39  ;;  %v112_v39 = vadd.f32 %v1573_v7, %v111_v38 }
 0x26a   :  { %456 = vmatpush.msra.mxu2 %v1525_v0 }
 0x26c   :  { %457 = vmatpush.msra.mxu2 %v1530_v1 }
 0x26e   :  { %458 = vmatpush.msra.mxu2 %v1542_v4 }
 0x270   :  { %459 = vmatpush.msra.mxu2 %v1550_v5 }
 0x2ec   :  { %v213_v42 = vpop.f32.mrf.mxu2 }
 0x2ed   :  { %v214_v43 = vadd.f32 %v213_v42, %v106_v41 }
 0x2ef   :  { %1341 = vtanh.f32 %v214_v43  ;;  %v1287_v45 = vmul.f32 -1.442695, %v214_v43 }
 0x2f1   :  { %1343 = vpow2.f32 %v1287_v45 }
 0x2f5   :  { %v1342_v44 = vpop.eup %1341 }
 0x2f6   :  { %238 = vrot.lane.b32.xlu2 %v1342_v44, %s1463_s25 }
 0x2f7   :  { %v1344_v46 = vpop.eup %1343 }
 0x2f8   :  { %v219_v47 = vadd.f32 1.0, %v1344_v46 }
 0x2fa   :  { %1345 = vrcp.f32 %v219_v47  ;;  %v231_v53 = vand.u32 2147483648, %v219_v47  ;;  %vm225_vm7 = vweird.f32 %v219_v47  ;;  %v229_v54 = vand.u32 2147483647, %v219_v47 }
 0x2fc   :  { %v232_v56 = vor.u32 1.1754944e-38, %v231_v53  ;;  %vm230_vm9 = vcmp.eq.f32.partialorder %v229_v54, 8.507059e+37 }
 0x300   :  { %v1346_v48 = vpop.eup %1345 }
 0x301   :  { %v221_v49 = vmul.f32 %v1346_v48, %v219_v47  ;;  %vm226_vm6 = vweird.f32 %v1346_v48 }
 0x302   :  { %vm227_vm8 = vmor %vm225_vm7, %vm226_vm6 }
 0x303   :  { %v222_v50 = vsub.f32 1.0, %v221_v49 }
 0x305   :  { %v223_v51 = vmul.f32 %v1346_v48, %v222_v50 }
 0x307   :  { %v224_v52 = vadd.f32 %v1346_v48, %v223_v51 }
 0x309   :  { %v228_v55 = vsel %vm227_vm8, %v1346_v48, %v224_v52 }
 0x30a   :  { %v233_v58 = vsel %vm230_vm9, %v232_v56, %v228_v55 }
 0x30b   :  { %v236_v60 = vmul.f32 %v233_v58, %v184_v30 }
 0x350   :  { %v239_v57 = vpop.permute.xlu2 %238 }
 0x351   :  { %v241_v59 = vmul.f32 %v239_v57, %v233_v58 }
 0x353   :  { %243 = vrot.lane.b32.xlu2 %v241_v59, %s1464_s26 }
 0x3ad   :  { %v244_v61 = vpop.permute.xlu2 %243 }
 0x3ae   :  { %v246_v62 = vadd.f32 %v244_v61, %v236_v60 }
 0x3b0   :  { %1347 = vtanh.f32 %v246_v62 }
 0x3b6   :  { %v1348_v63 = vpop.eup %1347 }
 0x3b7   :  { %249 = vrot.lane.b32.xlu0 %v1348_v63, %s1463_s25 }
 0x429   :  { %v250_v3 = vpop.permute.xlu0 %249 }
 0x42a   :  { %v252_v8 = vmul.f32 %v250_v3, %v233_v58 }
 0x42c   :  { %254 = vrot.lane.b32.xlu1 %v252_v8, %s1464_s26  ;;  %v114_v8 = vpop.f32.mrf.mxu0 }
 0x49e   :  { %v255_v9 = vpop.permute.xlu1 %254 }
 0x49f   :  { %1288 = vmatmul.msk.f32.vlgmr.msrb.gmra.mxu1 %vm130_vm5, %v255_v9  ;;  %1301 = vmatmul.msk.f32.gmra.mxu3 %vm130_vm5, %v255_v9  ;;  %v115_v9 = vadd.f32 %v1573_v7, %v114_v8 }
 0x4a0   :  { %518 = vmatpush.msrb.mxu1 %v1525_v0 }
 0x4a2   :  { %519 = vmatpush.msrb.mxu1 %v1530_v1 }
 0x4a4   :  { %520 = vmatpush.msrb.mxu1 %v1542_v4 }
 0x4a6   :  { %521 = vmatpush.msrb.mxu1 %v1550_v5 }
 0x51c   :  { %v275_v12 = vpop.f32.mrf.mxu1 }
 0x51d   :  { %v276_v13 = vadd.f32 %v275_v12, %v109_v11 }
 0x51f   :  { %1349 = vtanh.f32 %v276_v13  ;;  %v1289_v15 = vmul.f32 -1.442695, %v276_v13 }
 0x521   :  { %1351 = vpow2.f32 %v1289_v15 }
 0x525   :  { %v1350_v14 = vpop.eup %1349 }
 0x526   :  { %300 = vrot.lane.b32.xlu2 %v1350_v14, %s1463_s25 }
 0x527   :  { %v1352_v16 = vpop.eup %1351 }
 0x528   :  { %v281_v17 = vadd.f32 1.0, %v1352_v16 }
 0x52a   :  { %1353 = vrcp.f32 %v281_v17  ;;  %v293_v23 = vand.u32 2147483648, %v281_v17  ;;  %vm287_vm11 = vweird.f32 %v281_v17  ;;  %v291_v24 = vand.u32 2147483647, %v281_v17 }
 0x52c   :  { %v294_v26 = vor.u32 1.1754944e-38, %v293_v23  ;;  %vm292_vm13 = vcmp.eq.f32.partialorder %v291_v24, 8.507059e+37 }
 0x530   :  { %v1354_v18 = vpop.eup %1353 }
 0x531   :  { %v283_v19 = vmul.f32 %v1354_v18, %v281_v17  ;;  %vm288_vm10 = vweird.f32 %v1354_v18 }
 0x532   :  { %vm289_vm12 = vmor %vm287_vm11, %vm288_vm10 }
 0x533   :  { %v284_v20 = vsub.f32 1.0, %v283_v19 }
 0x535   :  { %v285_v21 = vmul.f32 %v1354_v18, %v284_v20 }
 0x537   :  { %v286_v22 = vadd.f32 %v1354_v18, %v285_v21 }
 0x539   :  { %v290_v25 = vsel %vm289_vm12, %v1354_v18, %v286_v22 }
 0x53a   :  { %v295_v28 = vsel %vm292_vm13, %v294_v26, %v290_v25 }
 0x53b   :  { %v298_v30 = vmul.f32 %v295_v28, %v246_v62 }
 0x580   :  { %v301_v27 = vpop.permute.xlu2 %300 }
 0x581   :  { %v303_v29 = vmul.f32 %v301_v27, %v295_v28 }
 0x583   :  { %305 = vrot.lane.b32.xlu0 %v303_v29, %s1464_s26 }
 0x5f5   :  { %v306_v31 = vpop.permute.xlu0 %305 }
 0x5f6   :  { %v308_v32 = vadd.f32 %v306_v31, %v298_v30  ;;  %v1274_v30 = vld [vmem:[%s1872_s0 + $0x28] sm:$0xff] }
 0x5f7   :  { %1282 = vmatmul.msk.f32.gmra.mxu0 %vm60_vm0, %v1274_v30 }
 0x5f8   :  { %1355 = vtanh.f32 %v308_v32 }
 0x5fe   :  { %v1356_v33 = vpop.eup %1355 }
 0x5ff   :  { %311 = vrot.lane.b32.xlu1 %v1356_v33, %s1463_s25 }
 0x671   :  { %v312_v35 = vpop.permute.xlu1 %311 }
 0x672   :  { %v314_v36 = vmul.f32 %v312_v35, %v295_v28 }
 0x674   :  { %316 = vrot.lane.b32.xlu2 %v314_v36, %s1464_s26 }
 0x6ce   :  { %v317_v37 = vpop.permute.xlu2 %316 }
 0x6cf   :  { %1290 = vmatmul.msk.f32.vlgmr.msra.gmra.mxu1 %vm130_vm5, %v317_v37  ;;  %1302 = vmatmul.msk.f32.gmra.mxu3 %vm130_vm5, %v317_v37 }
 0x74c   :  { %v337_v40 = vpop.f32.mrf.mxu1 }
 0x74d   :  { %v338_v41 = vadd.f32 %v337_v40, %v112_v39 }
 0x74f   :  { %1357 = vtanh.f32 %v338_v41  ;;  %v1291_v43 = vmul.f32 -1.442695, %v338_v41 }
 0x751   :  { %1359 = vpow2.f32 %v1291_v43 }
 0x755   :  { %v1358_v42 = vpop.eup %1357 }
 0x756   :  { %362 = vrot.lane.b32.xlu0 %v1358_v42, %s1463_s25 }
 0x757   :  { %v1360_v44 = vpop.eup %1359 }
 0x758   :  { %v343_v45 = vadd.f32 1.0, %v1360_v44 }
 0x75a   :  { %1361 = vrcp.f32 %v343_v45  ;;  %v355_v51 = vand.u32 2147483648, %v343_v45  ;;  %vm349_vm15 = vweird.f32 %v343_v45  ;;  %v353_v52 = vand.u32 2147483647, %v343_v45 }
 0x75c   :  { %v356_v54 = vor.u32 1.1754944e-38, %v355_v51  ;;  %vm354_vm2 = vcmp.eq.f32.partialorder %v353_v52, 8.507059e+37 }
 0x760   :  { %v1362_v46 = vpop.eup %1361 }
 0x761   :  { %v345_v47 = vmul.f32 %v1362_v46, %v343_v45  ;;  %vm350_vm14 = vweird.f32 %v1362_v46 }
 0x762   :  { %vm351_vm1 = vmor %vm349_vm15, %vm350_vm14 }
 0x763   :  { %v346_v48 = vsub.f32 1.0, %v345_v47 }
 0x765   :  { %v347_v49 = vmul.f32 %v1362_v46, %v346_v48 }
 0x767   :  { %v348_v50 = vadd.f32 %v1362_v46, %v347_v49 }
 0x769   :  { %v352_v53 = vsel %vm351_vm1, %v1362_v46, %v348_v50 }
 0x76a   :  { %v357_v56 = vsel %vm354_vm2, %v356_v54, %v352_v53 }
 0x76b   :  { %v360_v58 = vmul.f32 %v357_v56, %v308_v32  ;;  %v117_v32 = vpop.f32.mrf.mxu0 }
 0x76c   :  { %v118_v33 = vadd.f32 %v1573_v7, %v117_v32 }
 0x7c8   :  { %v363_v55 = vpop.permute.xlu0 %362 }
 0x7c9   :  { %v365_v57 = vmul.f32 %v363_v55, %v357_v56 }
 0x7cb   :  { %367 = vrot.lane.b32.xlu1 %v365_v57, %s1464_s26 }
 0x83d   :  { %v368_v59 = vpop.permute.xlu1 %367 }
 0x83e   :  { %v370_v60 = vadd.f32 %v368_v59, %v360_v58  ;;  %v1669_v59 = vld [vmem:[%s1876_s6 + $0x18] sm:$0xff] }
 0x83f   :  { %695 = vmatpush.msra.mxu1 %v1669_v59 }
 0x840   :  { %1363 = vtanh.f32 %v370_v60 }
 0x846   :  { %v1364_v61 = vpop.eup %1363 }
 0x847   :  { %373 = vrot.lane.b32.xlu2 %v1364_v61, %s1463_s25  ;;  %v1681_v61 = vld [vmem:[%s1876_s6 + $0x8] sm:$0xff] }
 0x8a1   :  { %v374_v62 = vpop.permute.xlu2 %373 }
 0x8a2   :  { %v376_v63 = vmul.f32 %v374_v62, %v357_v56  ;;  %v1275_v56 = vld [vmem:[%s1872_s0 + $0x30] sm:$0xff]  ;;  %v1688_v62 = vld [vmem:[%s1876_s6] sm:$0xff] }
 0x8a3   :  { %1283 = vmatmul.msk.f32.gmra.mxu0 %vm60_vm0, %v1275_v56 }
 0x8a4   :  { %378 = vrot.lane.b32.xlu0 %v376_v63, %s1464_s26 }
 0x916   :  { %v379_v3 = vpop.permute.xlu0 %378 }
 0x917   :  { %1292 = vmatmul.msk.f32.vlgmr.msrb.gmra.mxu2 %vm130_vm5, %v379_v3  ;;  %1303 = vmatmul.msk.f32.gmra.mxu3 %vm130_vm5, %v379_v3 }
 0x918   :  { %580 = vmatpush.msrb.mxu2 %v1525_v0 }
 0x91a   :  { %581 = vmatpush.msrb.mxu2 %v1530_v1 }
 0x91c   :  { %582 = vmatpush.msrb.mxu2 %v1542_v4 }
 0x91e   :  { %583 = vmatpush.msrb.mxu2 %v1550_v5 }
 0x920   :  { %v120_v2 = vpop.f32.mrf.mxu0 }
 0x921   :  { %v121_v3 = vadd.f32 %v1573_v7, %v120_v2 }
 0x99a   :  { %v399_v10 = vpop.f32.mrf.mxu2 }
 0x99b   :  { %v400_v11 = vadd.f32 %v399_v10, %v115_v9  ;;  %v1709_v10 = vld [vmem:[%s1875_s7] ss:$0 sm:$0xff] }
 0x99d   :  { %1365 = vtanh.f32 %v400_v11  ;;  %v1293_v13 = vmul.f32 -1.442695, %v400_v11 }
 0x99f   :  { %1367 = vpow2.f32 %v1293_v13 }
 0x9a3   :  { %v1366_v12 = vpop.eup %1365 }
 0x9a4   :  { %424 = vrot.lane.b32.xlu1 %v1366_v12, %s1463_s25 }
 0x9a5   :  { %v1368_v14 = vpop.eup %1367 }
 0x9a6   :  { %v405_v15 = vadd.f32 1.0, %v1368_v14 }
 0x9a8   :  { %1369 = vrcp.f32 %v405_v15  ;;  %v417_v5 = vand.u32 2147483648, %v405_v15  ;;  %vm411_vm4 = vweird.f32 %v405_v15  ;;  %v415_v18 = vand.u32 2147483647, %v405_v15 }
 0x9aa   :  { %v418_v20 = vor.u32 1.1754944e-38, %v417_v5  ;;  %vm416_vm7 = vcmp.eq.f32.partialorder %v415_v18, 8.507059e+37 }
 0x9ae   :  { %v1370_v0 = vpop.eup %1369 }
 0x9af   :  { %v407_v1 = vmul.f32 %v1370_v0, %v405_v15  ;;  %vm412_vm3 = vweird.f32 %v1370_v0 }
 0x9b0   :  { %vm413_vm6 = vmor %vm411_vm4, %vm412_vm3 }
 0x9b1   :  { %v408_v16 = vsub.f32 1.0, %v407_v1 }
 0x9b3   :  { %v409_v4 = vmul.f32 %v1370_v0, %v408_v16 }
 0x9b5   :  { %v410_v17 = vadd.f32 %v1370_v0, %v409_v4 }
 0x9b7   :  { %v414_v19 = vsel %vm413_vm6, %v1370_v0, %v410_v17 }
 0x9b8   :  { %v419_v22 = vsel %vm416_vm7, %v418_v20, %v414_v19 }
 0x9b9   :  { %v422_v24 = vmul.f32 %v419_v22, %v370_v60  ;;  %v1674_v60 = vld [vmem:[%s1876_s6 + $0x10] sm:$0xff] }
 0x9ba   :  { %696 = vmatpush.msra.mxu1 %v1674_v60 }
 0x9bc   :  { %697 = vmatpush.msra.mxu1 %v1681_v61 }
 0x9be   :  { %698 = vmatpush.msra.mxu1 %v1688_v62 }
 0xa16   :  { %v425_v21 = vpop.permute.xlu1 %424 }
 0xa17   :  { %v427_v23 = vmul.f32 %v425_v21, %v419_v22 }
 0xa19   :  { %429 = vrot.lane.b32.xlu2 %v427_v23, %s1464_s26 }
 0xa73   :  { %v430_v25 = vpop.permute.xlu2 %429 }
 0xa74   :  { %v432_v26 = vadd.f32 %v430_v25, %v422_v24 }
 0xa76   :  { %1371 = vtanh.f32 %v432_v26 }
 0xa7c   :  { %v1372_v27 = vpop.eup %1371 }
 0xa7d   :  { %435 = vrot.lane.b32.xlu0 %v1372_v27, %s1463_s25 }
 0xaef   :  { %v436_v28 = vpop.permute.xlu0 %435 }
 0xaf0   :  { %v438_v29 = vmul.f32 %v436_v28, %v419_v22 }
 0xaf2   :  { %440 = vrot.lane.b32.xlu1 %v438_v29, %s1464_s26 }
 0xb64   :  { %v441_v31 = vpop.permute.xlu1 %440 }
 0xb65   :  { %1294 = vmatmul.msk.f32.vlgmr.msra.gmra.mxu2 %vm130_vm5, %v441_v31  ;;  %1304 = vmatmul.msk.f32.gmra.mxu3 %vm130_vm5, %v441_v31 }
 0xb66   :  { %768 = vmatpush.msra.mxu2 %v1669_v59 }
 0xb68   :  { %769 = vmatpush.msra.mxu2 %v1674_v60 }
 0xb6a   :  { %770 = vmatpush.msra.mxu2 %v1681_v61 }
 0xb6c   :  { %771 = vmatpush.msra.mxu2 %v1688_v62 }
 0xbe8   :  { %v461_v34 = vpop.f32.mrf.mxu2 }
 0xbe9   :  { %v462_v35 = vadd.f32 %v461_v34, %v118_v33 }
 0xbeb   :  { %1373 = vtanh.f32 %v462_v35  ;;  %v1295_v37 = vmul.f32 -1.442695, %v462_v35 }
 0xbed   :  { %1375 = vpow2.f32 %v1295_v37 }
 0xbf1   :  { %v1374_v36 = vpop.eup %1373 }
 0xbf2   :  { %486 = vrot.lane.b32.xlu2 %v1374_v36, %s1463_s25 }
 0xbf3   :  { %v1376_v38 = vpop.eup %1375 }
 0xbf4   :  { %v467_v39 = vadd.f32 1.0, %v1376_v38 }
 0xbf6   :  { %1377 = vrcp.f32 %v467_v39  ;;  %v479_v45 = vand.u32 2147483648, %v467_v39  ;;  %vm473_vm9 = vweird.f32 %v467_v39  ;;  %v477_v46 = vand.u32 2147483647, %v467_v39 }
 0xbf8   :  { %v480_v48 = vor.u32 1.1754944e-38, %v479_v45  ;;  %vm478_vm11 = vcmp.eq.f32.partialorder %v477_v46, 8.507059e+37 }
 0xbfc   :  { %v1378_v40 = vpop.eup %1377 }
 0xbfd   :  { %v469_v41 = vmul.f32 %v1378_v40, %v467_v39  ;;  %vm474_vm8 = vweird.f32 %v1378_v40 }
 0xbfe   :  { %vm475_vm10 = vmor %vm473_vm9, %vm474_vm8 }
 0xbff   :  { %v470_v42 = vsub.f32 1.0, %v469_v41 }
 0xc01   :  { %v471_v43 = vmul.f32 %v1378_v40, %v470_v42 }
 0xc03   :  { %v472_v44 = vadd.f32 %v1378_v40, %v471_v43 }
 0xc05   :  { %v476_v47 = vsel %vm475_vm10, %v1378_v40, %v472_v44 }
 0xc06   :  { %v481_v50 = vsel %vm478_vm11, %v480_v48, %v476_v47 }
 0xc07   :  { %v484_v52 = vmul.f32 %v481_v50, %v432_v26 }
 0xc4c   :  { %v487_v49 = vpop.permute.xlu2 %486 }
 0xc4d   :  { %v489_v51 = vmul.f32 %v487_v49, %v481_v50 }
 0xc4f   :  { %491 = vrot.lane.b32.xlu0 %v489_v51, %s1464_s26 }
 0xcc1   :  { %v492_v53 = vpop.permute.xlu0 %491 }
 0xcc2   :  { %v1657_v54 = vadd.f32 %v492_v53, %v484_v52  ;;  %v1276_v53 = vld [vmem:[%s1872_s0 + $0x38] sm:$0xff] }
 0xcc3   :  { %1284 = vmatmul.msk.f32.gmra.mxu0 %vm60_vm0, %v1276_v53 }
 0xcc4   :  { %1379 = vtanh.f32 %v1657_v54 }
 0xcca   :  { %v1380_v55 = vpop.eup %1379 }
 0xccb   :  { %497 = vrot.lane.b32.xlu1 %v1380_v55, %s1463_s25 }
 0xd3d   :  { %v498_v57 = vpop.permute.xlu1 %497 }
 0xd3e   :  { %v500_v58 = vmul.f32 %v498_v57, %v481_v50 }
 0xd40   :  { %502 = vrot.lane.b32.xlu2 %v500_v58, %s1464_s26 }
 0xd9a   :  { %v503_v63 = vpop.permute.xlu2 %502 }
 0xd9b   :  { %1296 = vmatmul.msk.f32.vlgmr.msrb.gmra.mxu1 %vm130_vm5, %v503_v63  ;;  %1305 = vmatmul.msk.f32.gmra.mxu3 %vm130_vm5, %v503_v63 }
 0xd9c   :  { %838 = vmatpush.msrb.mxu1 %v1669_v59 }
 0xd9e   :  { %839 = vmatpush.msrb.mxu1 %v1674_v60 }
 0xda0   :  { %840 = vmatpush.msrb.mxu1 %v1681_v61 }
 0xda2   :  { %841 = vmatpush.msrb.mxu1 %v1688_v62 }
 0xda3   :  { %699 = vmatmul.f32.vlgmr.msra.gmra.mxu1 %v1462_v6  ;;  %v655_v6 = vpop.f32.mrf.mxu3 }
 0xda4   :  { %978 = vmatpush.msra.mxu1 %v1669_v59  ;;  %v656_v11 = vadd.f32 %v1709_v10, %v655_v6 }
 0xda6   :  { %979 = vmatpush.msra.mxu1 %v1674_v60 }
 0xda8   :  { %980 = vmatpush.msra.mxu1 %v1681_v61 }
 0xdaa   :  { %981 = vmatpush.msra.mxu1 %v1688_v62 }
 0xdab   :  { %v658_v57 = vpop.f32.mrf.mxu3 }
 0xdac   :  { %v659_v58 = vadd.f32 %v1709_v10, %v658_v57 }
 0xe18   :  { %v523_v8 = vpop.f32.mrf.mxu1 }
 0xe19   :  { %v524_v9 = vadd.f32 %v523_v8, %v121_v3 }
 0xe1b   :  { %1381 = vtanh.f32 %v524_v9  ;;  %v1297_v7 = vmul.f32 -1.442695, %v524_v9 }
 0xe20   :  { %v700_v12 = vpop.f32.mrf.mxu1 }
 0xe21   :  { %v1382_v13 = vpop.eup %1381  ;;  %v701_v14 = vadd.f32 %v700_v12, %v656_v11 }
 0xe22   :  { %548 = vrot.lane.b32.xlu0 %v1382_v13, %s1463_s25 }
 0xe23   :  { %1383 = vtanh.f32 %v701_v14  ;;  %v1308_v0 = vmul.f32 -1.442695, %v701_v14 }
 0xe24   :  { %1385 = vpow2.f32 %v1297_v7 }
 0xe25   :  { %1387 = vpow2.f32 %v1308_v0 }
 0xe29   :  { %v1384_v15 = vpop.eup %1383 }
 0xe2a   :  { %725 = vrot.lane.b32.xlu1 %v1384_v15, %s1463_s25  ;;  %v1386_v1 = vpop.eup %1385 }
 0xe2b   :  { %v529_v16 = vadd.f32 1.0, %v1386_v1  ;;  %v1388_v4 = vpop.eup %1387 }
 0xe2c   :  { %v706_v17 = vadd.f32 1.0, %v1388_v4 }
 0xe2d   :  { %1389 = vrcp.f32 %v529_v16  ;;  %v541_v25 = vand.u32 2147483648, %v529_v16  ;;  %vm535_vm13 = vweird.f32 %v529_v16  ;;  %v539_v26 = vand.u32 2147483647, %v529_v16 }
 0xe2e   :  { %1391 = vrcp.f32 %v706_v17  ;;  %v718_v34 = vand.u32 2147483648, %v706_v17  ;;  %vm712_vm2 = vweird.f32 %v706_v17  ;;  %v716_v35 = vand.u32 2147483647, %v706_v17 }
 0xe2f   :  { %v542_v29 = vor.u32 1.1754944e-38, %v541_v25  ;;  %vm540_vm15 = vcmp.eq.f32.partialorder %v539_v26, 8.507059e+37  ;;  %v661_v25 = vpop.f32.mrf.mxu3 }
 0xe30   :  { %v719_v37 = vor.u32 1.1754944e-38, %v718_v34  ;;  %vm717_vm4 = vcmp.eq.f32.partialorder %v716_v35, 8.507059e+37  ;;  %v662_v26 = vadd.f32 %v1709_v10, %v661_v25 }
 0xe33   :  { %v1390_v5 = vpop.eup %1389 }
 0xe34   :  { %v531_v18 = vmul.f32 %v1390_v5, %v529_v16  ;;  %v1392_v20 = vpop.eup %1391  ;;  %vm536_vm12 = vweird.f32 %v1390_v5 }
 0xe35   :  { %v708_v22 = vmul.f32 %v1392_v20, %v706_v17  ;;  %vm537_vm14 = vmor %vm535_vm13, %vm536_vm12  ;;  %vm713_vm1 = vweird.f32 %v1392_v20 }
 0xe36   :  { %v532_v19 = vsub.f32 1.0, %v531_v18  ;;  %vm714_vm3 = vmor %vm712_vm2, %vm713_vm1 }
 0xe37   :  { %v709_v24 = vsub.f32 1.0, %v708_v22 }
 0xe38   :  { %v533_v21 = vmul.f32 %v1390_v5, %v532_v19 }
 0xe39   :  { %v710_v28 = vmul.f32 %v1392_v20, %v709_v24 }
 0xe3a   :  { %v534_v23 = vadd.f32 %v1390_v5, %v533_v21 }
 0xe3b   :  { %v711_v33 = vadd.f32 %v1392_v20, %v710_v28 }
 0xe3c   :  { %v538_v27 = vsel %vm537_vm14, %v1390_v5, %v534_v23 }
 0xe3d   :  { %v543_v31 = vsel %vm540_vm15, %v542_v29, %v538_v27  ;;  %v715_v36 = vsel %vm714_vm3, %v1392_v20, %v711_v33 }
 0xe3e   :  { %v720_v39 = vsel %vm717_vm4, %v719_v37, %v715_v36  ;;  %v546_v41 = vmul.f32 %v543_v31, %v1657_v54 }
 0xe3f   :  { %v723_v45 = vmul.f32 0.0, %v720_v39 }
 0xe94   :  { %v549_v30 = vpop.permute.xlu0 %548 }
 0xe95   :  { %v551_v32 = vmul.f32 %v549_v30, %v543_v31 }
 0xe97   :  { %553 = vrot.lane.b32.xlu2 %v551_v32, %s1464_s26 }
 0xe9c   :  { %v726_v38 = vpop.permute.xlu1 %725 }
 0xe9d   :  { %v728_v40 = vmul.f32 %v726_v38, %v720_v39 }
 0xe9f   :  { %730 = vrot.lane.b32.xlu0 %v728_v40, %s1464_s26 }
 0xef1   :  { %v554_v42 = vpop.permute.xlu2 %553 }
 0xef2   :  { %v1717_v43 = vadd.f32 %v554_v42, %v546_v41 }
 0xef4   :  { %1393 = vtanh.f32 %v1717_v43 }
 0xefa   :  { %v1394_v44 = vpop.eup %1393 }
 0xefb   :  { %559 = vrot.lane.b32.xlu1 %v1394_v44, %s1463_s25 }
 0xf11   :  { %v731_v46 = vpop.permute.xlu0 %730 }
 0xf12   :  { %v733_v47 = vadd.f32 %v731_v46, %v723_v45 }
 0xf14   :  { %1395 = vtanh.f32 %v733_v47 }
 0xf1a   :  { %v1396_v48 = vpop.eup %1395 }
 0xf1b   :  { %736 = vrot.lane.b32.xlu2 %v1396_v48, %s1463_s25 }
 0xf6d   :  { %v560_v49 = vpop.permute.xlu1 %559 }
 0xf6e   :  { %v562_v50 = vmul.f32 %v560_v49, %v543_v31 }
 0xf70   :  { %564 = vrot.lane.b32.xlu0 %v562_v50, %s1464_s26 }
 0xf75   :  { %v737_v51 = vpop.permute.xlu2 %736 }
 0xf76   :  { %v1723_v52 = vmul.f32 %v737_v51, %v720_v39 }
 0xf78   :  { %752 = vrot.lane.b32.xlu1 %v1723_v52, %s1464_s26 }
 0xfe2   :  { %v565_v54 = vpop.permute.xlu0 %564 }
 0xfe3   :  { %1298 = vmatmul.msk.f32.vlgmr.msrb.gmra.mxu2 %vm130_vm5, %v565_v54  ;;  %1306 = vmatmul.msk.f32.gmra.mxu3 %vm130_vm5, %v565_v54  ;;  %v664_v54 = vpop.f32.mrf.mxu3 }
 0xfe4   :  { %908 = vmatpush.msrb.mxu2 %v1669_v59 }
 0xfe6   :  { %909 = vmatpush.msrb.mxu2 %v1674_v60 }
 0xfe8   :  { %910 = vmatpush.msrb.mxu2 %v1681_v61 }
 0xfea   :  { %v753_v55 = vpop.permute.xlu1 %752  ;;  %911 = vmatpush.msrb.mxu2 %v1688_v62 }
 0xfeb   :  { %1309 = vmatmul.msk.f32.vlgmr.msra.gmra.mxu2 %vm130_vm5, %v753_v55  ;;  %v665_v55 = vadd.f32 %v1709_v10, %v664_v54 }
 0xfec   :  { %1048 = vmatpush.msra.mxu2 %v1669_v59 }
 0xfee   :  { %1049 = vmatpush.msra.mxu2 %v1674_v60 }
 0xff0   :  { %1050 = vmatpush.msra.mxu2 %v1681_v61 }
 0xff2   :  { %1051 = vmatpush.msra.mxu2 %v1688_v62 }
0x1066   :  { %v1742_v56 = vpop.f32.mrf.mxu2 }
0x106e   :  { %v773_v63 = vpop.f32.mrf.mxu2 }
0x106f   :  { %v774_v2 = vadd.f32 %v773_v63, %v659_v58 }
0x1071   :  { %1397 = vtanh.f32 %v774_v2  ;;  %v1310_v8 = vmul.f32 -1.442695, %v774_v2 }
0x1073   :  { %1399 = vpow2.f32 %v1310_v8 }
0x1077   :  { %v1398_v3 = vpop.eup %1397 }
0x1078   :  { %798 = vrot.lane.b32.xlu2 %v1398_v3, %s1463_s25 }
0x1079   :  { %v1400_v9 = vpop.eup %1399 }
0x107a   :  { %v779_v6 = vadd.f32 1.0, %v1400_v9 }
0x107c   :  { %1401 = vrcp.f32 %v779_v6  ;;  %v791_v7 = vand.u32 2147483648, %v779_v6  ;;  %vm785_vm7 = vweird.f32 %v779_v6  ;;  %v789_v0 = vand.u32 2147483647, %v779_v6 }
0x107e   :  { %v792_v16 = vor.u32 1.1754944e-38, %v791_v7  ;;  %vm790_vm9 = vcmp.eq.f32.partialorder %v789_v0, 8.507059e+37 }
0x1082   :  { %v1402_v11 = vpop.eup %1401 }
0x1083   :  { %v781_v12 = vmul.f32 %v1402_v11, %v779_v6  ;;  %vm786_vm6 = vweird.f32 %v1402_v11 }
0x1084   :  { %vm787_vm8 = vmor %vm785_vm7, %vm786_vm6 }
0x1085   :  { %v782_v13 = vsub.f32 1.0, %v781_v12 }
0x1087   :  { %v783_v14 = vmul.f32 %v1402_v11, %v782_v13 }
0x1089   :  { %v784_v15 = vadd.f32 %v1402_v11, %v783_v14 }
0x108b   :  { %v788_v1 = vsel %vm787_vm8, %v1402_v11, %v784_v15 }
0x108c   :  { %v793_v17 = vsel %vm790_vm9, %v792_v16, %v788_v1 }
0x108d   :  { %v796_v18 = vmul.f32 %v793_v17, %v733_v47 }
0x10d2   :  { %v799_v4 = vpop.permute.xlu2 %798 }
0x10d3   :  { %v801_v5 = vmul.f32 %v799_v4, %v793_v17 }
0x10d5   :  { %803 = vrot.lane.b32.xlu0 %v801_v5, %s1464_s26 }
0x1147   :  { %v804_v19 = vpop.permute.xlu0 %803 }
0x1148   :  { %v806_v20 = vadd.f32 %v804_v19, %v796_v18  ;;  %v667_v19 = vpop.f32.mrf.mxu3 }
0x114a   :  { %1403 = vtanh.f32 %v806_v20 }
0x1150   :  { %v1404_v21 = vpop.eup %1403 }
0x1151   :  { %809 = vrot.lane.b32.xlu1 %v1404_v21, %s1463_s25 }
0x11c3   :  { %v810_v22 = vpop.permute.xlu1 %809 }
0x11c4   :  { %v1748_v23 = vmul.f32 %v810_v22, %v793_v17 }
0x11c6   :  { %822 = vrot.lane.b32.xlu2 %v1748_v23, %s1464_s26 }
0x1220   :  { %v823_v24 = vpop.permute.xlu2 %822 }
0x1221   :  { %1311 = vmatmul.msk.f32.vlgmr.msrb.gmra.mxu1 %vm130_vm5, %v823_v24 }
0x1222   :  { %1118 = vmatpush.msrb.mxu1 %v1669_v59 }
0x1224   :  { %1119 = vmatpush.msrb.mxu1 %v1674_v60 }
0x1226   :  { %1120 = vmatpush.msrb.mxu1 %v1681_v61 }
0x1228   :  { %1121 = vmatpush.msrb.mxu1 %v1688_v62 }
0x129e   :  { %v843_v27 = vpop.f32.mrf.mxu1 }
0x129f   :  { %v844_v28 = vadd.f32 %v843_v27, %v662_v26 }
0x12a1   :  { %1405 = vtanh.f32 %v844_v28  ;;  %v1312_v30 = vmul.f32 -1.442695, %v844_v28 }
0x12a3   :  { %1407 = vpow2.f32 %v1312_v30 }
0x12a7   :  { %v1406_v29 = vpop.eup %1405 }
0x12a8   :  { %868 = vrot.lane.b32.xlu0 %v1406_v29, %s1463_s25 }
0x12a9   :  { %v1408_v31 = vpop.eup %1407 }
0x12aa   :  { %v849_v32 = vadd.f32 1.0, %v1408_v31 }
0x12ac   :  { %1409 = vrcp.f32 %v849_v32  ;;  %v861_v38 = vand.u32 2147483648, %v849_v32  ;;  %vm855_vm11 = vweird.f32 %v849_v32  ;;  %v859_v39 = vand.u32 2147483647, %v849_v32 }
0x12ae   :  { %v862_v41 = vor.u32 1.1754944e-38, %v861_v38  ;;  %vm860_vm13 = vcmp.eq.f32.partialorder %v859_v39, 8.507059e+37 }
0x12b2   :  { %v1410_v33 = vpop.eup %1409 }
0x12b3   :  { %v851_v34 = vmul.f32 %v1410_v33, %v849_v32  ;;  %vm856_vm10 = vweird.f32 %v1410_v33 }
0x12b4   :  { %vm857_vm12 = vmor %vm855_vm11, %vm856_vm10 }
0x12b5   :  { %v852_v35 = vsub.f32 1.0, %v851_v34 }
0x12b7   :  { %v853_v36 = vmul.f32 %v1410_v33, %v852_v35 }
0x12b9   :  { %v854_v37 = vadd.f32 %v1410_v33, %v853_v36 }
0x12bb   :  { %v858_v40 = vsel %vm857_vm12, %v1410_v33, %v854_v37 }
0x12bc   :  { %v863_v44 = vsel %vm860_vm13, %v862_v41, %v858_v40 }
0x12bd   :  { %v866_v46 = vmul.f32 %v863_v44, %v806_v20  ;;  %v668_v20 = vadd.f32 %v1709_v10, %v667_v19 }
0x131a   :  { %v869_v42 = vpop.permute.xlu0 %868 }
0x131b   :  { %v871_v45 = vmul.f32 %v869_v42, %v863_v44 }
0x131d   :  { %873 = vrot.lane.b32.xlu1 %v871_v45, %s1464_s26 }
0x138f   :  { %v874_v47 = vpop.permute.xlu1 %873 }
0x1390   :  { %v876_v48 = vadd.f32 %v874_v47, %v866_v46 }
0x1392   :  { %1411 = vtanh.f32 %v876_v48 }
0x1398   :  { %v1412_v49 = vpop.eup %1411 }
0x1399   :  { %879 = vrot.lane.b32.xlu2 %v1412_v49, %s1463_s25 }
0x13f3   :  { %v880_v50 = vpop.permute.xlu2 %879 }
0x13f4   :  { %v1761_v51 = vmul.f32 %v880_v50, %v863_v44 }
0x13f6   :  { %892 = vrot.lane.b32.xlu0 %v1761_v51, %s1464_s26 }
0x1468   :  { %v893_v53 = vpop.permute.xlu0 %892 }
0x1469   :  { %1313 = vmatmul.msk.f32.vlgmr.msrb.gmra.mxu2 %vm130_vm5, %v893_v53 }
0x146a   :  { %1188 = vmatpush.msrb.mxu2 %v1669_v59 }
0x146c   :  { %1189 = vmatpush.msrb.mxu2 %v1674_v60 }
0x146e   :  { %1190 = vmatpush.msrb.mxu2 %v1681_v61 }
0x1470   :  { %1191 = vmatpush.msrb.mxu2 %v1688_v62 }
0x14ec   :  { %v913_v57 = vpop.f32.mrf.mxu2 }
0x14ed   :  { %v914_v58 = vadd.f32 %v913_v57, %v665_v55 }
0x14ef   :  { %1413 = vtanh.f32 %v914_v58  ;;  %v1314_v2 = vmul.f32 -1.442695, %v914_v58 }
0x14f1   :  { %1415 = vpow2.f32 %v1314_v2 }
0x14f5   :  { %v1414_v63 = vpop.eup %1413 }
0x14f6   :  { %938 = vrot.lane.b32.xlu1 %v1414_v63, %s1463_s25 }
0x14f7   :  { %v1416_v3 = vpop.eup %1415 }
0x14f8   :  { %v919_v8 = vadd.f32 1.0, %v1416_v3 }
0x14fa   :  { %1417 = vrcp.f32 %v919_v8  ;;  %v931_v62 = vand.u32 2147483648, %v919_v8  ;;  %vm925_vm15 = vweird.f32 %v919_v8  ;;  %v929_v11 = vand.u32 2147483647, %v919_v8 }
0x14fc   :  { %v932_v13 = vor.u32 1.1754944e-38, %v931_v62  ;;  %vm930_vm2 = vcmp.eq.f32.partialorder %v929_v11, 8.507059e+37 }
0x1500   :  { %v1418_v59 = vpop.eup %1417 }
0x1501   :  { %v921_v60 = vmul.f32 %v1418_v59, %v919_v8  ;;  %vm926_vm14 = vweird.f32 %v1418_v59 }
0x1502   :  { %vm927_vm1 = vmor %vm925_vm15, %vm926_vm14 }
0x1503   :  { %v922_v9 = vsub.f32 1.0, %v921_v60 }
0x1505   :  { %v923_v61 = vmul.f32 %v1418_v59, %v922_v9 }
0x1507   :  { %v924_v6 = vadd.f32 %v1418_v59, %v923_v61 }
0x1509   :  { %v928_v12 = vsel %vm927_vm1, %v1418_v59, %v924_v6  ;;  %v123_v59 = vpop.f32.mrf.mxu0  ;;  %v1461_v6 = vld [vmem:[%s1873_s4] ss:$0 sm:$0xff] }
0x150a   :  { %v933_v15 = vsel %vm930_vm2, %v932_v13, %v928_v12  ;;  %v124_v62 = vadd.f32 %v1461_v6, %v123_v59 }
0x150b   :  { %v936_v0 = vmul.f32 %v933_v15, %v876_v48  ;;  %v670_v48 = vpop.f32.mrf.mxu3 }
0x150c   :  { %v671_v49 = vadd.f32 %v1709_v10, %v670_v48  ;;  %v586_v13 = vadd.f32 %v1742_v56, %v124_v62 }
0x1568   :  { %v939_v14 = vpop.permute.xlu1 %938 }
0x1569   :  { %v941_v7 = vmul.f32 %v939_v14, %v933_v15 }
0x156b   :  { %943 = vrot.lane.b32.xlu2 %v941_v7, %s1464_s26 }
0x15c5   :  { %v944_v1 = vpop.permute.xlu2 %943 }
0x15c6   :  { %v946_v16 = vadd.f32 %v944_v1, %v936_v0 }
0x15c8   :  { %1419 = vtanh.f32 %v946_v16 }
0x15ce   :  { %v1420_v4 = vpop.eup %1419 }
0x15cf   :  { %949 = vrot.lane.b32.xlu0 %v1420_v4, %s1463_s25 }
0x1641   :  { %v950_v17 = vpop.permute.xlu0 %949 }
0x1642   :  { %v1774_v5 = vmul.f32 %v950_v17, %v933_v15 }
0x1644   :  { %962 = vrot.lane.b32.xlu1 %v1774_v5, %s1464_s26 }
0x16b6   :  { %v963_v18 = vpop.permute.xlu1 %962 }
0x16b7   :  { %1315 = vmatmul.msk.f32.vlgmr.msra.gmra.mxu1 %vm130_vm5, %v963_v18  ;;  %v1299_v18 = vmul.f32 -1.442695, %v586_v13 }
0x1734   :  { %v983_v21 = vpop.f32.mrf.mxu1 }
0x1735   :  { %v984_v22 = vadd.f32 %v983_v21, %v668_v20 }
0x1737   :  { %1421 = vtanh.f32 %v984_v22  ;;  %v1316_v25 = vmul.f32 -1.442695, %v984_v22 }
0x1739   :  { %1423 = vpow2.f32 %v1316_v25 }
0x173d   :  { %v1422_v24 = vpop.eup %1421 }
0x173e   :  { %1008 = vrot.lane.b32.xlu2 %v1422_v24, %s1463_s25 }
0x173f   :  { %v1424_v26 = vpop.eup %1423 }
0x1740   :  { %v989_v27 = vadd.f32 1.0, %v1424_v26 }
0x1742   :  { %1425 = vrcp.f32 %v989_v27  ;;  %v1001_v33 = vand.u32 2147483648, %v989_v27  ;;  %vm995_vm4 = vweird.f32 %v989_v27  ;;  %v999_v34 = vand.u32 2147483647, %v989_v27 }
0x1744   :  { %v1002_v36 = vor.u32 1.1754944e-38, %v1001_v33  ;;  %vm1000_vm7 = vcmp.eq.f32.partialorder %v999_v34, 8.507059e+37 }
0x1748   :  { %v1426_v28 = vpop.eup %1425 }
0x1749   :  { %v991_v29 = vmul.f32 %v1426_v28, %v989_v27  ;;  %vm996_vm3 = vweird.f32 %v1426_v28 }
0x174a   :  { %vm997_vm6 = vmor %vm995_vm4, %vm996_vm3 }
0x174b   :  { %v992_v30 = vsub.f32 1.0, %v991_v29 }
0x174d   :  { %v993_v31 = vmul.f32 %v1426_v28, %v992_v30 }
0x174f   :  { %v994_v32 = vadd.f32 %v1426_v28, %v993_v31 }
0x1751   :  { %v998_v35 = vsel %vm997_vm6, %v1426_v28, %v994_v32 }
0x1752   :  { %v1003_v38 = vsel %vm1000_vm7, %v1002_v36, %v998_v35  ;;  %v673_v36 = vpop.f32.mrf.mxu3 }
0x1753   :  { %v1006_v40 = vmul.f32 %v1003_v38, %v946_v16 }
0x1798   :  { %v1009_v37 = vpop.permute.xlu2 %1008 }
0x1799   :  { %v1011_v39 = vmul.f32 %v1009_v37, %v1003_v38  ;;  %v674_v37 = vadd.f32 %v1709_v10, %v673_v36 }
0x179b   :  { %1013 = vrot.lane.b32.xlu0 %v1011_v39, %s1464_s26 }
0x180d   :  { %v1014_v41 = vpop.permute.xlu0 %1013 }
0x180e   :  { %v1016_v42 = vadd.f32 %v1014_v41, %v1006_v40 }
0x1810   :  { %1427 = vtanh.f32 %v1016_v42 }
0x1816   :  { %v1428_v44 = vpop.eup %1427 }
0x1817   :  { %1019 = vrot.lane.b32.xlu1 %v1428_v44, %s1463_s25 }
0x1889   :  { %v1020_v45 = vpop.permute.xlu1 %1019 }
0x188a   :  { %v1783_v46 = vmul.f32 %v1020_v45, %v1003_v38 }
0x188c   :  { %1032 = vrot.lane.b32.xlu2 %v1783_v46, %s1464_s26 }
0x18e6   :  { %v1033_v47 = vpop.permute.xlu2 %1032 }
0x18e7   :  { %1317 = vmatmul.msk.f32.vlgmr.msra.gmra.mxu2 %vm130_vm5, %v1033_v47 }
0x196a   :  { %v1053_v50 = vpop.f32.mrf.mxu2 }
0x196b   :  { %v1054_v53 = vadd.f32 %v1053_v50, %v671_v49 }
0x196d   :  { %1429 = vtanh.f32 %v1054_v53  ;;  %v1318_v55 = vmul.f32 -1.442695, %v1054_v53 }
0x196f   :  { %1431 = vpow2.f32 %v1318_v55 }
0x1973   :  { %v1430_v54 = vpop.eup %1429 }
0x1974   :  { %1078 = vrot.lane.b32.xlu0 %v1430_v54, %s1463_s25 }
0x1975   :  { %v1432_v57 = vpop.eup %1431 }
0x1976   :  { %v1059_v58 = vadd.f32 1.0, %v1432_v57 }
0x1978   :  { %1433 = vrcp.f32 %v1059_v58  ;;  %v1071_v9 = vand.u32 2147483648, %v1059_v58  ;;  %vm1065_vm9 = vweird.f32 %v1059_v58  ;;  %v1069_v61 = vand.u32 2147483647, %v1059_v58 }
0x1979   :  { %1435 = vtanh.f32 %v586_v13 }
0x197a   :  { %v1072_v12 = vor.u32 1.1754944e-38, %v1071_v9  ;;  %vm1070_vm11 = vcmp.eq.f32.partialorder %v1069_v61, 8.507059e+37  ;;  %v1331_v61 = vld [vmem:[%s1877_s8] ss:$0 sm:$0xff] }
0x197e   :  { %v1434_v63 = vpop.eup %1433 }
0x197f   :  { %v1061_v2 = vmul.f32 %v1434_v63, %v1059_v58  ;;  %vm1066_vm8 = vweird.f32 %v1434_v63  ;;  %v1436_v0 = vpop.eup %1435 }
0x1980   :  { %vm1067_vm10 = vmor %vm1065_vm9, %vm1066_vm8 }
0x1981   :  { %v1062_v3 = vsub.f32 1.0, %v1061_v2 }
0x1983   :  { %v1063_v8 = vmul.f32 %v1434_v63, %v1062_v3 }
0x1985   :  { %v1064_v60 = vadd.f32 %v1434_v63, %v1063_v8 }
0x1987   :  { %v1068_v11 = vsel %vm1067_vm10, %v1434_v63, %v1064_v60  ;;  %vm1241_vm10 = vcmask 7168  }
0x1988   :  { %v1073_v15 = vsel %vm1070_vm11, %v1072_v12, %v1068_v11  ;;  %vm1243_vm11 = vcmask 15360  }
0x1989   :  { %v1076_v1 = vmul.f32 %v1073_v15, %v1016_v42 }
0x19e6   :  { %v1079_v14 = vpop.permute.xlu0 %1078 }
0x19e7   :  { %v1081_v7 = vmul.f32 %v1079_v14, %v1073_v15 }
0x19e9   :  { %1083 = vrot.lane.b32.xlu1 %v1081_v7, %s1464_s26 }
0x19f1   :  { %610 = vrot.lane.b32.xlu1 %v1436_v0, %s1463_s25 }
0x1a5b   :  { %v1084_v16 = vpop.permute.xlu1 %1083 }
0x1a5c   :  { %v1796_v4 = vadd.f32 %v1084_v16, %v1076_v1 }
0x1a5e   :  { %1437 = vtanh.f32 %v1796_v4 }
0x1a5f   :  { %1439 = vpow2.f32 %v1299_v18 }
0x1a63   :  { %v611_v32 = vpop.permute.xlu1 %610 }
0x1a64   :  { %v1438_v17 = vpop.eup %1437 }
0x1a65   :  { %1089 = vrot.lane.b32.xlu2 %v1438_v17, %s1463_s25  ;;  %v1440_v56 = vpop.eup %1439 }
0x1a66   :  { %v591_v19 = vadd.f32 1.0, %v1440_v56 }
0x1a68   :  { %1441 = vrcp.f32 %v591_v19  ;;  %v603_v28 = vand.u32 2147483648, %v591_v19  ;;  %vm597_vm13 = vweird.f32 %v591_v19  ;;  %v601_v29 = vand.u32 2147483647, %v591_v19 }
0x1a6a   :  { %v604_v31 = vor.u32 1.1754944e-38, %v603_v28  ;;  %vm602_vm15 = vcmp.eq.f32.partialorder %v601_v29, 8.507059e+37 }
0x1a6e   :  { %v1442_v20 = vpop.eup %1441 }
0x1a6f   :  { %v593_v21 = vmul.f32 %v1442_v20, %v591_v19  ;;  %vm598_vm12 = vweird.f32 %v1442_v20 }
0x1a70   :  { %vm599_vm14 = vmor %vm597_vm13, %vm598_vm12  ;;  %vm1245_vm12 = vcmask 23552   ;;  %vm1247_vm13 = vcmask 31744  }
0x1a71   :  { %v594_v22 = vsub.f32 1.0, %v593_v21 }
0x1a73   :  { %v595_v24 = vmul.f32 %v1442_v20, %v594_v22 }
0x1a75   :  { %v596_v26 = vadd.f32 %v1442_v20, %v595_v24 }
0x1a77   :  { %v600_v30 = vsel %vm599_vm14, %v1442_v20, %v596_v26  ;;  %vm1249_vm14 = vcmask 39936  }
0x1a78   :  { %v605_v33 = vsel %vm602_vm15, %v604_v31, %v600_v30  ;;  %vm1251_vm15 = vcmask 48128  }
0x1a79   :  { %v613_v34 = vmul.f32 %v611_v32, %v605_v33  ;;  %v608_v41 = vmul.f32 %v605_v33, %v1717_v43 }
0x1abf   :  { %v1090_v25 = vpop.permute.xlu2 %1089 }
0x1ac0   :  { %v1800_v27 = vmul.f32 %v1090_v25, %v1073_v15 }
0x1ac2   :  { %1102 = vrot.lane.b32.xlu0 %v1800_v27, %s1464_s26 }
0x1aca   :  { %615 = vrot.lane.b32.xlu0 %v613_v34, %s1464_s26 }
0x1b34   :  { %v1103_v35 = vpop.permute.xlu0 %1102 }
0x1b35   :  { %1319 = vmatmul.msk.f32.vlgmr.msrb.gmra.mxu1 %vm130_vm5, %v1103_v35 }
0x1b3c   :  { %v616_v40 = vpop.permute.xlu0 %615 }
0x1b3d   :  { %v618_v42 = vadd.f32 %v616_v40, %v608_v41 }
0x1bb2   :  { %v1123_v38 = vpop.f32.mrf.mxu1 }
0x1bb3   :  { %v1124_v39 = vadd.f32 %v1123_v38, %v674_v37 }
0x1bb5   :  { %1443 = vtanh.f32 %v1124_v39  ;;  %v1320_v47 = vmul.f32 -1.442695, %v1124_v39 }
0x1bb6   :  { %1445 = vtanh.f32 %v618_v42 }
0x1bb7   :  { %1447 = vpow2.f32 %v1320_v47 }
0x1bbb   :  { %v1444_v44 = vpop.eup %1443 }
0x1bbc   :  { %1148 = vrot.lane.b32.xlu2 %v1444_v44, %s1463_s25  ;;  %v1446_v45 = vpop.eup %1445 }
0x1bbd   :  { %v1448_v48 = vpop.eup %1447 }
0x1bbe   :  { %v1129_v49 = vadd.f32 1.0, %v1448_v48 }
0x1bc0   :  { %1449 = vrcp.f32 %v1129_v49  ;;  %v1141_v43 = vand.u32 2147483648, %v1129_v49  ;;  %vm1135_vm2 = vweird.f32 %v1129_v49  ;;  %v1139_v58 = vand.u32 2147483647, %v1129_v49 }
0x1bc2   :  { %v1142_v2 = vor.u32 1.1754944e-38, %v1141_v43  ;;  %vm1140_vm4 = vcmp.eq.f32.partialorder %v1139_v58, 8.507059e+37 }
0x1bc4   :  { %621 = vrot.lane.b32.xlu2 %v1446_v45, %s1463_s25 }
0x1bc6   :  { %v1450_v50 = vpop.eup %1449 }
0x1bc7   :  { %v1131_v53 = vmul.f32 %v1450_v50, %v1129_v49  ;;  %vm1136_vm1 = vweird.f32 %v1450_v50 }
0x1bc8   :  { %vm1137_vm3 = vmor %vm1135_vm2, %vm1136_vm1  ;;  %vm1253_vm1 = vcmask 56320  }
0x1bc9   :  { %v1132_v54 = vsub.f32 1.0, %v1131_v53 }
0x1bcb   :  { %v1133_v55 = vmul.f32 %v1450_v50, %v1132_v54 }
0x1bcd   :  { %v1134_v57 = vadd.f32 %v1450_v50, %v1133_v55 }
0x1bcf   :  { %v1138_v63 = vsel %vm1137_vm3, %v1450_v50, %v1134_v57 }
0x1bd0   :  { %v1143_v8 = vsel %vm1140_vm4, %v1142_v2, %v1138_v63 }
0x1bd1   :  { %v1146_v6 = vmul.f32 %v1143_v8, %v1796_v4 }
0x1c16   :  { %v1149_v3 = vpop.permute.xlu2 %1148 }
0x1c17   :  { %v1151_v59 = vmul.f32 %v1149_v3, %v1143_v8 }
0x1c19   :  { %1153 = vrot.lane.b32.xlu1 %v1151_v59, %s1464_s26 }
0x1c1e   :  { %v622_v60 = vpop.permute.xlu2 %621 }
0x1c1f   :  { %v624_v9 = vmul.f32 %v622_v60, %v605_v33 }
0x1c21   :  { %634 = vrot.lane.b32.xlu1 %v624_v9, %s1464_s26  ;;  %v15_v9 = vstv %s1878_s9 }
0x1c22   :  { %16 = vst [vmem:[#allocation2] sm:$0x1] %v15_v9 }
0x1c29   :  { %740 = vrot.lane.b32.xlu1 %v1331_v61, %s1465_s17  ;;  %v1466_v61 = vmov 0  }
0x1c2a   :  { %1328 = vset.pattern.permute.xlu0 %v1466_v61 }
0x1c8b   :  { %v1154_v62 = vpop.permute.xlu1 %1153 }
0x1c8c   :  { %v1156_v11 = vadd.f32 %v1154_v62, %v1146_v6  ;;  %v1332_v6 = vld [vmem:[#allocation2] ss:$0 sm:$0xff] }
0x1c8e   :  { %1451 = vtanh.f32 %v1156_v11 }
0x1c93   :  { %v635_v12 = vpop.permute.xlu1 %634 }
0x1c94   :  { %v1452_v13 = vpop.eup %1451  ;;  %1307 = vmatmul.msk.f32.gmra.mxu3 %vm130_vm5, %v635_v12 }
0x1c95   :  { %1159 = vrot.lane.b32.xlu0 %v1452_v13, %s1463_s25 }
0x1c9b   :  { %v1822_v7 = vpop.permute.xlu1 %740 }
0x1c9c   :  { %v743_v0 = vmul.f32 %v1822_v7, %v1723_v52  ;;  %v813_v1 = vmul.f32 %v1748_v23, %v1822_v7  ;;  %v883_v16 = vmul.f32 %v1761_v51, %v1822_v7  ;;  %v953_v40 = vmul.f32 %v1774_v5, %v1822_v7 }
0x1c9d   :  { %v1023_v47 = vmul.f32 %v1783_v46, %v1822_v7  ;;  %v1093_v48 = vmul.f32 %v1800_v27, %v1822_v7 }
0x1d07   :  { %v1160_v14 = vpop.permute.xlu0 %1159 }
0x1d08   :  { %v1818_v15 = vmul.f32 %v1160_v14, %v1143_v8 }
0x1d0a   :  { %1172 = vrot.lane.b32.xlu2 %v1818_v15, %s1464_s26  ;;  %v1163_v63 = vmul.f32 %v1818_v15, %v1822_v7 }
0x1d12   :  { %745 = vrot.lane.b32.xlu2 %v743_v0, %s1464_s26 }
0x1d17   :  { %v676_v19 = vpop.f32.mrf.mxu3 }
0x1d18   :  { %v677_v20 = vadd.f32 %v1709_v10, %v676_v19 }
0x1d1a   :  { %815 = vrot.lane.b32.xlu2 %v813_v1, %s1464_s26 }
0x1d22   :  { %885 = vrot.lane.b32.xlu2 %v883_v16, %s1464_s26 }
0x1d64   :  { %v1173_v4 = vpop.permute.xlu2 %1172 }
0x1d65   :  { %1321 = vmatmul.msk.f32.vlgmr.msrb.gmra.mxu2 %vm130_vm5, %v1173_v4 }
0x1d6c   :  { %v746_v17 = vpop.permute.xlu2 %745 }
0x1d6d   :  { %v748_v51 = vsel %vm130_vm5, %v746_v17, 0.0 }
0x1d74   :  { %v816_v18 = vpop.permute.xlu2 %815 }
0x1d75   :  { %v818_v39 = vsel %vm130_vm5, %v816_v18, 0.0  ;;  %v1263_v18 = vld [vmem:[%s1879_s1] sm:$0xff] }
0x1d7c   :  { %v886_v56 = vpop.permute.xlu2 %885 }
0x1d7d   :  { %v888_v52 = vsel %vm130_vm5, %v886_v56, 0.0 }
0x1d7e   :  { %889 = vadd.xlane.f32.xlu2 %v888_v52 }
0x1de8   :  { %v1193_v23 = vpop.f32.mrf.mxu2 }
0x1de9   :  { %v1194_v21 = vadd.f32 %v1193_v23, %v677_v20 }
0x1deb   :  { %1453 = vtanh.f32 %v1194_v21  ;;  %v1322_v24 = vmul.f32 -1.442695, %v1194_v21 }
0x1ded   :  { %1455 = vpow2.f32 %v1322_v24 }
0x1df1   :  { %v1454_v22 = vpop.eup %1453  ;;  %v890_v2 = vpop.xlane.xlu2 %889 }
0x1df2   :  { %1218 = vrot.lane.b32.xlu0 %v1454_v22, %s1463_s25 }
0x1df3   :  { %v1456_v25 = vpop.eup %1455 }
0x1df4   :  { %v1199_v26 = vadd.f32 1.0, %v1456_v25 }
0x1df6   :  { %1457 = vrcp.f32 %v1199_v26  ;;  %v1211_v10 = vand.u32 2147483648, %v1199_v26  ;;  %vm1205_vm7 = vweird.f32 %v1199_v26  ;;  %v1209_v33 = vand.u32 2147483647, %v1199_v26 }
0x1df8   :  { %v1212_v35 = vor.u32 1.1754944e-38, %v1211_v10  ;;  %vm1210_vm9 = vcmp.eq.f32.partialorder %v1209_v33, 8.507059e+37 }
0x1dfc   :  { %v1458_v28 = vpop.eup %1457 }
0x1dfd   :  { %v1201_v29 = vmul.f32 %v1458_v28, %v1199_v26  ;;  %vm1206_vm6 = vweird.f32 %v1458_v28 }
0x1dfe   :  { %vm1207_vm8 = vmor %vm1205_vm7, %vm1206_vm6 }
0x1dff   :  { %v1202_v30 = vsub.f32 1.0, %v1201_v29 }
0x1e01   :  { %v1203_v31 = vmul.f32 %v1458_v28, %v1202_v30 }
0x1e03   :  { %v1204_v32 = vadd.f32 %v1458_v28, %v1203_v31 }
0x1e05   :  { %v1208_v34 = vsel %vm1207_vm8, %v1458_v28, %v1204_v32 }
0x1e06   :  { %v1213_v37 = vsel %vm1210_vm9, %v1212_v35, %v1208_v34 }
0x1e07   :  { %v1216_v41 = vmul.f32 %v1213_v37, %v1156_v11 }
0x1e1c   :  { %749 = vadd.xlane.f32.xlu0 %v748_v51 }
0x1e64   :  { %v1219_v36 = vpop.permute.xlu0 %1218 }
0x1e65   :  { %v1221_v38 = vmul.f32 %v1219_v36, %v1213_v37 }
0x1e67   :  { %1223 = vrot.lane.b32.xlu1 %v1221_v38, %s1464_s26 }
0x1e8f   :  { %v750_v53 = vpop.xlane.xlu0 %749 }
0x1e91   :  { %819 = vadd.xlane.f32.xlu1 %v818_v39 }
0x1eaa   :  { %955 = vrot.lane.b32.xlu1 %v953_v40, %s1464_s26 }
0x1ed9   :  { %v1224_v42 = vpop.permute.xlu1 %1223 }
0x1eda   :  { %v1226_v44 = vadd.f32 %v1224_v42, %v1216_v41 }
0x1edc   :  { %1459 = vtanh.f32 %v1226_v44 }
0x1ee2   :  { %v1460_v45 = vpop.eup %1459 }
0x1ee3   :  { %1229 = vrot.lane.b32.xlu0 %v1460_v45, %s1463_s25 }
0x1eeb   :  { %1025 = vrot.lane.b32.xlu0 %v1023_v47, %s1464_s26 }
0x1ef3   :  { %1095 = vrot.lane.b32.xlu0 %v1093_v48, %s1464_s26 }
0x1f04   :  { %v820_v5 = vpop.xlane.xlu1 %819 }
0x1f05   :  { %v1242_v3 = vsel %vm1241_vm10, %v750_v53, %v820_v5 }
0x1f06   :  { %v1244_v8 = vsel %vm1243_vm11, %v1242_v3, %v890_v2 }
0x1f1c   :  { %v956_v49 = vpop.permute.xlu1 %955 }
0x1f1d   :  { %v958_v50 = vsel %vm130_vm5, %v956_v49, 0.0 }
0x1f1e   :  { %959 = vadd.xlane.f32.xlu2 %v958_v50 }
0x1f55   :  { %v1230_v54 = vpop.permute.xlu0 %1229 }
0x1f56   :  { %v1232_v55 = vmul.f32 %v1230_v54, %v1213_v37 }
0x1f58   :  { %v1233_v57 = vmul.f32 %v1232_v55, %v1822_v7 }
0x1f5a   :  { %1235 = vrot.lane.b32.xlu1 %v1233_v57, %s1464_s26 }
0x1f5d   :  { %v1026_v46 = vpop.permute.xlu0 %1025 }
0x1f5e   :  { %v1028_v43 = vsel %vm130_vm5, %v1026_v46, 0.0 }
0x1f5f   :  { %1029 = vadd.xlane.f32.xlu2 %v1028_v43 }
0x1f65   :  { %v1096_v58 = vpop.permute.xlu0 %1095 }
0x1f66   :  { %v1098_v27 = vsel %vm130_vm5, %v1096_v58, 0.0 }
0x1f67   :  { %1099 = vadd.xlane.f32.xlu0 %v1098_v27 }
0x1f77   :  { %1165 = vrot.lane.b32.xlu2 %v1163_v63, %s1464_s26 }
0x1f7b   :  { %1259 = vperm.xlu0 %1328, %v1332_v6  }
0x1f91   :  { %v960_v59 = vpop.xlane.xlu2 %959 }
0x1f92   :  { %v1246_v60 = vsel %vm1245_vm12, %v1244_v8, %v960_v59 }
0x1fcc   :  { %v1236_v62 = vpop.permute.xlu1 %1235 }
0x1fcd   :  { %v1238_v11 = vsel %vm130_vm5, %v1236_v62, 0.0 }
0x1fce   :  { %1239 = vadd.xlane.f32.xlu2 %v1238_v11 }
0x1fd2   :  { %v1030_v12 = vpop.xlane.xlu2 %1029 }
0x1fd3   :  { %v1248_v13 = vsel %vm1247_vm13, %v1246_v60, %v1030_v12 }
0x1fda   :  { %v1166_v14 = vpop.permute.xlu2 %1165  ;;  %v1100_v7 = vpop.xlane.xlu0 %1099 }
0x1fdb   :  { %v1168_v15 = vsel %vm130_vm5, %v1166_v14, 0.0  ;;  %v1250_v0 = vsel %vm1249_vm14, %v1248_v13, %v1100_v7 }
0x1fdc   :  { %1169 = vadd.xlane.f32.xlu1 %v1168_v15 }
0x1fed   :  { %v1260_v16 = vpop.permute.xlu0 %1259 }
0x2041   :  { %v1240_v4 = vpop.xlane.xlu2 %1239 }
0x204f   :  { %v1170_v1 = vpop.xlane.xlu1 %1169 }
0x2050   :  { %v1252_v17 = vsel %vm1251_vm15, %v1250_v0, %v1170_v1 }
0x2051   :  { %v1254_v56 = vsel %vm1253_vm1, %v1252_v17, %v1240_v4 }
0x2052   :  { %v1262_v52 = vadd.f32 %v1260_v16, %v1254_v56 }
0x2054   :  { %v1264_v19 = vadd.f32 %v1263_v18, %v1262_v52 }
0x2056   :  { %1265 = vst.msk [vmem:[%s1880_s10] sm:$0xff] %vm60_vm0, %v1264_v19 }

</bundles_post_ra>
